<compile_context>
chip_gen: v6e
topology: v6e:2x2x1
jax: 0.10.0
libtpu: 0.0.40
codegen_flags: <defaults>
</compile_context>

<pallas_src>
import jax
import jax.numpy as jnp
from jax.experimental import pallas as pl
from jax.experimental.pallas import tpu as pltpu


def _round_up(x, m):
    return (x + m - 1) // m * m


def _num_n_tiles():
    """2 output-feature tiles on v7x (2 TensorCores/chip), otherwise 1."""
    try:
        kind = jax.devices()[0].device_kind.lower()
    except Exception:
        return 1
    return 2 if ("v7" in kind or "7x" in kind) else 1


def linear_kernel(x_ref, wt_ref, b_ref, o_ref):
    # x_ref:  (M, Kp)  bf16 activations (zero-padded K), resident across N tiles
    # wt_ref: (Kp, TN) bf16 weight tile (W.T, zero-padded, tile-major storage)
    # b_ref:  (1, TN)  f32 bias tile
    # o_ref:  (M, TN)  f32 output tile (tail columns masked by Pallas on store)
    acc = jnp.dot(x_ref[...], wt_ref[...], preferred_element_type=jnp.float32)
    o_ref[...] = (acc + b_ref[...]).astype(o_ref.dtype)


def _pallas_linear(x, wt_tiles, bias_tiles, n_out):
    """y = x @ W.T + b using pre-laid-out bf16 weight tiles.

    x:          (M, K)              f32
    wt_tiles:   (n_tiles, Kp, tn)   bf16, tile-major W.T (K and N zero-padded)
    bias_tiles: (n_tiles, 1, tn)    f32
    """
    M, K = x.shape
    n_tiles, Kp, tn = wt_tiles.shape

    # Pad K to the lane-aligned width baked into the weight and cast to bf16
    # (MXU-native input); accumulation stays f32 inside the kernel.
    x_p = jnp.pad(x, ((0, 0), (0, Kp - K))).astype(jnp.bfloat16)

    cost = pl.CostEstimate(
        flops=2 * M * Kp * n_tiles * tn,
        transcendentals=0,
        bytes_accessed=(M * Kp * 2                # x (bf16)
                        + n_tiles * Kp * tn * 2   # weight (bf16)
                        + M * n_out * 4           # output (f32)
                        + n_tiles * tn * 4),      # bias (f32)
    )

    return pl.pallas_call(
        linear_kernel,
        out_shape=jax.ShapeDtypeStruct((M, n_out), jnp.float32),
        grid_spec=pltpu.PrefetchScalarGridSpec(
            num_scalar_prefetch=0,
            grid=(n_tiles,),
            in_specs=[
                pl.BlockSpec((M, Kp), lambda i: (0, 0)),         # x resident
                pl.BlockSpec((None, Kp, tn), lambda i: (i, 0, 0)),  # contiguous weight tile
                pl.BlockSpec((None, 1, tn), lambda i: (i, 0, 0)),   # bias tile
            ],
            out_specs=pl.BlockSpec((M, tn), lambda i: (0, i)),
        ),
        compiler_params=pltpu.CompilerParams(
            dimension_semantics=("parallel",),
        ),
        cost_estimate=cost,
    )(x_p, wt_tiles, bias_tiles)


class PallasLinear:
    """Pallas equivalent of the torch Linear module (1000 -> 1000 with bias).

    All weight preparation (transpose, K/N zero-padding, bf16 cast, tile-major
    re-layout, bias reshape) happens once here, mirroring torch module
    __init__; the per-call path only pads/casts the small activation.
    """

    def __init__(self, weight, bias):
        # weight: (N, K) in the PyTorch convention; bias: (N,)
        n_out, k_in = weight.shape
        assert bias.shape == (n_out,)

        kp = _round_up(k_in, 128)     # 1000 -> 1024
        np_ = _round_up(n_out, 128)   # 1000 -> 1024
        n_tiles = _num_n_tiles()
        if np_ % (128 * n_tiles) != 0:
            n_tiles = 1
        tn = np_ // n_tiles

        wt = jnp.transpose(weight)                                # (K, N)
        wt = jnp.pad(wt, ((0, kp - k_in), (0, np_ - n_out)))      # (Kp, Np)
        # Tile-major contiguous layout: one contiguous DMA per (Kp, tn) tile.
        self.wt = (wt.reshape(kp, n_tiles, tn)
                     .transpose(1, 0, 2)
                     .astype(jnp.bfloat16))                       # (n_tiles, Kp, tn)

        b = jnp.pad(bias, (0, np_ - n_out)).astype(jnp.float32)
        self.bias = b.reshape(n_tiles, 1, tn)                     # (n_tiles, 1, tn)
        self.n_out = n_out

    def __call__(self, x):
        return _pallas_linear(x, self.wt, self.bias, self.n_out)


if __name__ == "__main__":
    key = jax.random.PRNGKey(0)
    k_x, k_w, k_b = jax.random.split(key, 3)

    # Module-implied shapes: in_features = out_features = 1000; small batch.
    M, K, N = 8, 1000, 1000
    x = jax.random.normal(k_x, (M, K), dtype=jnp.float32)
    weight = jax.random.normal(k_w, (N, K), dtype=jnp.float32)  # torch randn(1000, 1000)
    bias = jax.random.normal(k_b, (N,), dtype=jnp.float32)      # torch randn(1000)

    mod = PallasLinear(weight, bias)   # one-time transpose/pad/bf16/tile layout
    out = mod(x)
    jax.block_until_ready(out)

    # Correctness check against plain-JAX f32 reference of F.linear.
    # Tolerance reflects bf16 inputs with f32 accumulation at K=1000
    # (~0.5% relative error on outputs of magnitude ~sqrt(K)).
    ref = x @ weight.T + bias
    assert out.shape == (M, N)
    max_err = float(jnp.max(jnp.abs(out - ref)))
    assert jnp.allclose(out, ref, atol=1.0, rtol=2e-2), max_err

    print("KERNEL_OK")
</pallas_src>

<mosaic_0001>
module attributes {stable_mosaic.version = 11 : i64} {
  func.func @linear_kernel(%arg0: i32, %arg1: memref<8x1024xbf16, #tpu.memory_space<vmem>>, %arg2: memref<1x1024x1024xbf16, #tpu.memory_space<vmem>>, %arg3: memref<1x1x1024xf32, #tpu.memory_space<vmem>>, %arg4: memref<8x1024xf32, #tpu.memory_space<vmem>>) attributes {dimension_semantics = [#tpu.dimension_semantics<parallel>], iteration_bounds = array<i64: 1>, scalar_prefetch = 0 : i64, scratch_operands = 0 : i64, tpu.core_type = #tpu.core_type<tc>, window_params = [{pipeline_mode = #tpu.pipeline_mode<synchronous>, transform_indices = @transform_0, window_bounds = array<i64: 8, 1024>}, {transform_indices = @transform_1, window_bounds = array<i64: 1, 1024, 1024>}, {transform_indices = @transform_2, window_bounds = array<i64: 1, 1, 1024>}, {transform_indices = @transform_3, window_bounds = array<i64: 8, 1024>}]} {
    %c0 = arith.constant 0 : index
    %c0_0 = arith.constant 0 : index
    %0 = vector.load %arg1[%c0, %c0_0] : memref<8x1024xbf16, #tpu.memory_space<vmem>>, vector<8x1024xbf16>
    %c0_1 = arith.constant 0 : index
    %c0_2 = arith.constant 0 : index
    %c0_3 = arith.constant 0 : index
    %1 = vector.load %arg2[%c0_1, %c0_2, %c0_3] : memref<1x1024x1024xbf16, #tpu.memory_space<vmem>>, vector<1x1024x1024xbf16>
    %2 = vector.shape_cast %1 : vector<1x1024x1024xbf16> to vector<1024x1024xbf16>
    %cst = arith.constant dense<0.000000e+00> : vector<8x1024xf32>
    %3 = tpu.matmul %0, %2, %cst {dimension_numbers = #tpu.dot_dimension_numbers<[1], [0], [0], [1], [0, 0, 1, 1], [], []>} : vector<8x1024xbf16>, vector<1024x1024xbf16>, vector<8x1024xf32> -> vector<8x1024xf32>
    %c0_4 = arith.constant 0 : index
    %c0_5 = arith.constant 0 : index
    %c0_6 = arith.constant 0 : index
    %4 = vector.load %arg3[%c0_4, %c0_5, %c0_6] : memref<1x1x1024xf32, #tpu.memory_space<vmem>>, vector<1x1x1024xf32>
    %5 = vector.shape_cast %4 : vector<1x1x1024xf32> to vector<1x1024xf32>
    %6 = vector.broadcast %5 : vector<1x1024xf32> to vector<8x1024xf32>
    %7 = arith.addf %3, %6 : vector<8x1024xf32>
    %c0_7 = arith.constant 0 : index
    %c0_8 = arith.constant 0 : index
    %8 = vector.load %arg4[%c0_7, %c0_8] : memref<8x1024xf32, #tpu.memory_space<vmem>>, vector<8x1024xf32>
    tpu.vector_store %arg4[%c0_7, %c0_8], %7 {strides = array<i32>} : memref<8x1024xf32, #tpu.memory_space<vmem>>, vector<8x1024xf32>,
    return
  }
  func.func @transform_0(%arg0: i32) -> (i32, i32) {
    %c0_i32 = arith.constant 0 : i32
    %c0_i32_0 = arith.constant 0 : i32
    %c0_i32_1 = arith.constant 0 : i32
    return %c0_i32, %c0_i32_0 : i32, i32
  }
  func.func @transform_1(%arg0: i32) -> (i32, i32, i32) {
    %c0_i32 = arith.constant 0 : i32
    %c0_i32_0 = arith.constant 0 : i32
    %c0_i32_1 = arith.constant 0 : i32
    return %arg0, %c0_i32, %c0_i32_0 : i32, i32, i32
  }
  func.func @transform_2(%arg0: i32) -> (i32, i32, i32) {
    %c0_i32 = arith.constant 0 : i32
    %c0_i32_0 = arith.constant 0 : i32
    %c0_i32_1 = arith.constant 0 : i32
    return %arg0, %c0_i32, %c0_i32_0 : i32, i32, i32
  }
  func.func @transform_3(%arg0: i32) -> (i32, i32) {
    %c0_i32 = arith.constant 0 : i32
    %c0_i32_0 = arith.constant 0 : i32
    return %c0_i32, %arg0 : i32, i32
  }
}

</mosaic_0001>

<bundles_post_ra>
// kernel: tpu_custom_call.1
= control target key start
LH: loop header
LB: loop body
LE: loop exit
PB: predicated region body
PF: predicated region fallthrough
CT: control target
= control target key end

     0   :  { %8 = vsyncpa [#allocation3], 0  ;;  %s4649_s0 = inlined_call_operand.hbm [shape: bf16[8,1024], index: 0, kind: input, shape index: {}]   ;;  %s4650_s1 = inlined_call_operand.hbm [shape: bf16[1,1024,1024], index: 1, kind: input, shape index: {}]   ;;  %s4651_s2 = inlined_call_operand.hbm [shape: f32[1,1,1024], index: 2, kind: input, shape index: {}]   ;;  %s4652_s3 = inlined_call_operand.hbm [shape: f32[8,1000], index: 3, kind: output, shape index: {}]  }
   0x1   :  { %9 = vsyncpa [#allocation6], 0 }
   0x2   :  { %10 = vsyncpa [#allocation4], 0  ;;  %s4499_s12 = smov [#allocation5]  }
   0x3   :  { %s26_s13 = sshll.u32 %s4499_s12, 4  ;;  %s27_s13 = int_to_ptr.vmem [resolvable:$true] %s26_s13 }
   0x4   :  { %s4421_s14 = scalar_lea.vmem %s27_s13, 65536  ;;  %p4426_p1 = scmp.lt.s32.totalorder %s27_s13, %s27_s13 }
   0x5   :  { %p4422_p0 = scmp.ne.s32.totalorder %s27_s13, %s4421_s14  ;;  %p4427_p2 = scmp.lt.s32.totalorder %s4421_s14, %s4421_s14 }
   0x7   :  { %p4428_p3 = por %p4427_p2, %p4426_p1 }
   0x9   :  { %p4429_p4 = pnand %p4428_p3, %p4422_p0 }
   0xb   :  { %4432 = shalt.err (!%p4429_p4)
}
   0xc   :  { %s4500_s15 = smov 512   ;;  %s4501_s16 = smov 32  }
   0xd   :  { %32 = dma.hbm_to_vmem [thread:$0]  %s4650_s1, 65536, %s27_s13, [#allocation6], %s4500_s15, %s4500_s15, %s4501_s16  }
   0xe   :  { %s4502_s19 = smov [#allocation2]   ;;  %s4503_s21 = smov [#allocation7]  }
   0xf   :  { %s17_s20 = sshll.u32 %s4502_s19, 4  ;;  %s39_s22 = sshll.u32 %s4503_s21, 4  ;;  %s18_s20 = int_to_ptr.vmem [resolvable:$true] %s17_s20  ;;  %s40_s22 = int_to_ptr.vmem [resolvable:$true] %s39_s22 }
  0x10   :  { %s4441_s23 = scalar_lea.vmem %s18_s20, 512  ;;  %p4446_p6 = scmp.lt.s32.totalorder %s18_s20, %s18_s20 }
  0x11   :  { %p4442_p5 = scmp.ne.s32.totalorder %s18_s20, %s4441_s23  ;;  %p4447_p7 = scmp.lt.s32.totalorder %s4441_s23, %s4441_s23 }
  0x13   :  { %p4448_p8 = por %p4447_p7, %p4446_p6 }
  0x15   :  { %p4449_p9 = pnand %p4448_p8, %p4442_p5 }
  0x17   :  { %4452 = shalt.err (!%p4449_p9)
}
  0x18   :  { %20 = dma.hbm_to_vmem [thread:$0]  %s4649_s0, 512, %s18_s20, [#allocation3]  }
  0x19   :  { %s4461_s26 = scalar_lea.vmem %s40_s22, 128  ;;  %p4466_p11 = scmp.lt.s32.totalorder %s40_s22, %s40_s22 }
  0x1a   :  { %p4462_p10 = scmp.ne.s32.totalorder %s40_s22, %s4461_s26  ;;  %p4467_p12 = scmp.lt.s32.totalorder %s4461_s26, %s4461_s26 }
  0x1c   :  { %p4468_p13 = por %p4467_p12, %p4466_p11 }
  0x1e   :  { %p4469_p0 = pnand %p4468_p13, %p4462_p10 }
  0x20   :  { %4472 = shalt.err (!%p4469_p0)
}
  0x21   :  { %42 = dma.hbm_to_vmem [thread:$0]  %s4651_s2, 128, %s40_s22, [#allocation6]  }
  0x22   :  { %4493 = dma.done.wait [#allocation3], 512  }
  0x23   :  { %4494 = vsyncadd [#allocation3], 4294966784 }
  0x24   :  { %4495 = dma.done.wait [#allocation6], 65664  }
  0x25   :  { %4496 = vsyncadd [#allocation6], 4294901632  ;;  %v112_v0 = vld [vmem:[#allocation5 + $0x1c0] sm:$0xff]  ;;  %v4536_v54 = vld [vmem:[#allocation2 + $0x8] sm:$0xff]  ;;  %s4504_s0 = smov [#allocation8]  }
  0x26   :  { %v116_v1 = vld [vmem:[#allocation5 + $0x1e0] sm:$0xff]  ;;  %v4544_v59 = vcombine.high %v4536_v54, %v4536_v54  ;;  %s3868_s2 = sshll.u32 %s4504_s0, 4  ;;  %s3869_s2 = int_to_ptr.vmem [resolvable:$true] %s3868_s2 }
  0x27   :  { %v240_v2 = vld [vmem:[#allocation5 + $0x5c0] sm:$0xff]  ;;  %v3943_v3 = vcombine.high %v112_v0, %v116_v1  ;;  %v3942_v5 = vcombine.low %v112_v0, %v116_v1  ;;  %s4473_s28 = scalar_lea.vmem %s3869_s2, 1024  ;;  %p4478_p2 = scmp.lt.s32.totalorder %s3869_s2, %s3869_s2 }
  0x28   :  { %v244_v4 = vld [vmem:[#allocation5 + $0x5e0] sm:$0xff]  ;;  %3271 = vmatprep.mubr.bf16.mxu1 %v4544_v59  ;;  %p4474_p1 = scmp.ne.s32.totalorder %s3869_s2, %s4473_s28  ;;  %p4479_p3 = scmp.lt.s32.totalorder %s4473_s28, %s4473_s28 }
  0x29   :  { %v104_v6 = vld [vmem:[#allocation5 + $0x180] sm:$0xff]  ;;  %v4071_v8 = vcombine.high %v240_v2, %v244_v4  ;;  %v4070_v9 = vcombine.low %v240_v2, %v244_v4  ;;  %3198 = vmatprep.subr.bf16.mxu0 %v3943_v3 }
  0x2a   :  { %v108_v7 = vld [vmem:[#allocation5 + $0x1a0] sm:$0xff]  ;;  %3199 = vmatpush1.bf16.msra.mxu0 %v3942_v5  ;;  %p4480_p4 = por %p4479_p3, %p4478_p2 }
  0x2b   :  { %v3935_v10 = vcombine.high %v104_v6, %v108_v7  ;;  %v232_v11 = vld [vmem:[#allocation5 + $0x580] sm:$0xff]  ;;  %3239 = vmatprep.subr.bf16.mxu1 %v4071_v8  ;;  %v3934_v18 = vcombine.low %v104_v6, %v108_v7 }
  0x2c   :  { %v236_v12 = vld [vmem:[#allocation5 + $0x5a0] sm:$0xff]  ;;  %3240 = vmatpush1.bf16.msra.mxu1 %v4070_v9  ;;  %p4481_p5 = pnand %p4480_p4, %p4474_p1 }
  0x2d   :  { %v96_v13 = vld [vmem:[#allocation5 + $0x140] sm:$0xff]  ;;  %v4063_v14 = vcombine.high %v232_v11, %v236_v12  ;;  %3200 = vmatprep.subr.bf16.mxu0 %v3935_v10  ;;  %v4062_v19 = vcombine.low %v232_v11, %v236_v12 }
  0x2e   :  { %v100_v15 = vld [vmem:[#allocation5 + $0x160] sm:$0xff]  ;;  %3201 = vmatpush1.bf16.msra.mxu0 %v3934_v18 }
  0x2f   :  { %v224_v16 = vld [vmem:[#allocation5 + $0x540] sm:$0xff]  ;;  %v3927_v20 = vcombine.high %v96_v13, %v100_v15  ;;  %3241 = vmatprep.subr.bf16.mxu1 %v4063_v14  ;;  %v3926_v26 = vcombine.low %v96_v13, %v100_v15 }
  0x30   :  { %v228_v17 = vld [vmem:[#allocation5 + $0x560] sm:$0xff]  ;;  %3242 = vmatpush1.bf16.msra.mxu1 %v4062_v19 }
  0x31   :  { %v4055_v21 = vcombine.high %v224_v16, %v228_v17  ;;  %v88_v22 = vld [vmem:[#allocation5 + $0x100] sm:$0xff]  ;;  %3202 = vmatprep.subr.bf16.mxu0 %v3927_v20  ;;  %v4054_v27 = vcombine.low %v224_v16, %v228_v17 }
  0x32   :  { %v92_v23 = vld [vmem:[#allocation5 + $0x120] sm:$0xff]  ;;  %3203 = vmatpush1.bf16.msra.mxu0 %v3926_v26 }
  0x33   :  { %v216_v24 = vld [vmem:[#allocation5 + $0x500] sm:$0xff]  ;;  %v3919_v28 = vcombine.high %v88_v22, %v92_v23  ;;  %3243 = vmatprep.subr.bf16.mxu1 %v4055_v21  ;;  %v3918_v34 = vcombine.low %v88_v22, %v92_v23 }
  0x34   :  { %v220_v25 = vld [vmem:[#allocation5 + $0x520] sm:$0xff]  ;;  %3244 = vmatpush1.bf16.msra.mxu1 %v4054_v27 }
  0x35   :  { %v4047_v29 = vcombine.high %v216_v24, %v220_v25  ;;  %v80_v30 = vld [vmem:[#allocation5 + $0xc0] sm:$0xff]  ;;  %3204 = vmatprep.subr.bf16.mxu0 %v3919_v28  ;;  %v4046_v35 = vcombine.low %v216_v24, %v220_v25 }
  0x36   :  { %v84_v31 = vld [vmem:[#allocation5 + $0xe0] sm:$0xff]  ;;  %3205 = vmatpush1.bf16.msra.mxu0 %v3918_v34 }
  0x37   :  { %v208_v32 = vld [vmem:[#allocation5 + $0x4c0] sm:$0xff]  ;;  %v3911_v36 = vcombine.high %v80_v30, %v84_v31  ;;  %3245 = vmatprep.subr.bf16.mxu1 %v4047_v29  ;;  %v3910_v42 = vcombine.low %v80_v30, %v84_v31 }
  0x38   :  { %v212_v33 = vld [vmem:[#allocation5 + $0x4e0] sm:$0xff]  ;;  %3246 = vmatpush1.bf16.msra.mxu1 %v4046_v35 }
  0x39   :  { %v4039_v37 = vcombine.high %v208_v32, %v212_v33  ;;  %v72_v38 = vld [vmem:[#allocation5 + $0x80] sm:$0xff]  ;;  %3206 = vmatprep.subr.bf16.mxu0 %v3911_v36  ;;  %v4038_v43 = vcombine.low %v208_v32, %v212_v33 }
  0x3a   :  { %v76_v39 = vld [vmem:[#allocation5 + $0xa0] sm:$0xff]  ;;  %3207 = vmatpush1.bf16.msra.mxu0 %v3910_v42 }
  0x3b   :  { %v200_v40 = vld [vmem:[#allocation5 + $0x480] sm:$0xff]  ;;  %v3903_v44 = vcombine.high %v72_v38, %v76_v39  ;;  %3247 = vmatprep.subr.bf16.mxu1 %v4039_v37  ;;  %v3902_v50 = vcombine.low %v72_v38, %v76_v39 }
  0x3c   :  { %v204_v41 = vld [vmem:[#allocation5 + $0x4a0] sm:$0xff]  ;;  %3248 = vmatpush1.bf16.msra.mxu1 %v4038_v43 }
  0x3d   :  { %v4031_v45 = vcombine.high %v200_v40, %v204_v41  ;;  %v64_v46 = vld [vmem:[#allocation5 + $0x40] sm:$0xff]  ;;  %3208 = vmatprep.subr.bf16.mxu0 %v3903_v44  ;;  %v4030_v51 = vcombine.low %v200_v40, %v204_v41 }
  0x3e   :  { %v68_v47 = vld [vmem:[#allocation5 + $0x60] sm:$0xff]  ;;  %3209 = vmatpush1.bf16.msra.mxu0 %v3902_v50 }
  0x3f   :  { %v192_v48 = vld [vmem:[#allocation5 + $0x440] sm:$0xff]  ;;  %v3895_v52 = vcombine.high %v64_v46, %v68_v47  ;;  %3249 = vmatprep.subr.bf16.mxu1 %v4031_v45  ;;  %v3894_v62 = vcombine.low %v64_v46, %v68_v47 }
  0x40   :  { %v196_v49 = vld [vmem:[#allocation5 + $0x460] sm:$0xff]  ;;  %3250 = vmatpush1.bf16.msra.mxu1 %v4030_v51 }
  0x41   :  { %v4534_v53 = vld [vmem:[#allocation2] sm:$0xff]  ;;  %v4023_v55 = vcombine.high %v192_v48, %v196_v49  ;;  %3210 = vmatprep.subr.bf16.mxu0 %v3895_v52  ;;  %v4022_v63 = vcombine.low %v192_v48, %v196_v49 }
  0x42   :  { %v56_v56 = vld [vmem:[#allocation5] sm:$0xff]  ;;  %v4540_v58 = vcombine.high %v4534_v53, %v4534_v53  ;;  %3211 = vmatpush1.bf16.msra.mxu0 %v3894_v62 }
  0x43   :  { %v60_v57 = vld [vmem:[#allocation5 + $0x20] sm:$0xff]  ;;  %3251 = vmatprep.subr.bf16.mxu1 %v4023_v55 }
  0x44   :  { %v184_v60 = vld [vmem:[#allocation5 + $0x400] sm:$0xff]  ;;  %3230 = vmatprep.mubr.bf16.mxu0 %v4540_v58  ;;  %v3887_v0 = vcombine.high %v56_v56, %v60_v57  ;;  %v3886_v6 = vcombine.low %v56_v56, %v60_v57  ;;  %3252 = vmatpush1.bf16.msra.mxu1 %v4022_v63 }
  0x45   :  { %v188_v61 = vld [vmem:[#allocation5 + $0x420] sm:$0xff] }
  0x46   :  { %v4015_v1 = vcombine.high %v184_v60, %v188_v61  ;;  %v176_v2 = vld [vmem:[#allocation5 + $0x3c0] sm:$0xff]  ;;  %3212 = vmatprep.subr.bf16.mxu0 %v3887_v0  ;;  %v4014_v7 = vcombine.low %v184_v60, %v188_v61 }
  0x47   :  { %v180_v3 = vld [vmem:[#allocation5 + $0x3e0] sm:$0xff]  ;;  %3213 = vmatpush1.bf16.msra.mxu0 %v3886_v6 }
  0x48   :  { %v304_v4 = vld [vmem:[#allocation5 + $0x7c0] sm:$0xff]  ;;  %v4007_v8 = vcombine.high %v176_v2, %v180_v3  ;;  %3253 = vmatprep.subr.bf16.mxu1 %v4015_v1  ;;  %v4006_v14 = vcombine.low %v176_v2, %v180_v3 }
  0x49   :  { %v308_v5 = vld [vmem:[#allocation5 + $0x7e0] sm:$0xff]  ;;  %3254 = vmatpush1.bf16.msra.mxu1 %v4014_v7 }
  0x4a   :  { %v4135_v9 = vcombine.high %v304_v4, %v308_v5  ;;  %v168_v10 = vld [vmem:[#allocation5 + $0x380] sm:$0xff]  ;;  %3214 = vmatprep.subr.bf16.mxu0 %v4007_v8  ;;  %v4134_v15 = vcombine.low %v304_v4, %v308_v5 }
  0x4b   :  { %v172_v11 = vld [vmem:[#allocation5 + $0x3a0] sm:$0xff]  ;;  %3215 = vmatpush2.bf16.msra.mxu0 %v4006_v14 }
  0x4c   :  { %v296_v12 = vld [vmem:[#allocation5 + $0x780] sm:$0xff]  ;;  %v3999_v16 = vcombine.high %v168_v10, %v172_v11  ;;  %3255 = vmatprep.subr.bf16.mxu1 %v4135_v9  ;;  %v3998_v22 = vcombine.low %v168_v10, %v172_v11 }
  0x4d   :  { %v300_v13 = vld [vmem:[#allocation5 + $0x7a0] sm:$0xff]  ;;  %3256 = vmatpush2.bf16.msra.mxu1 %v4134_v15 }
  0x4e   :  { %v4127_v17 = vcombine.high %v296_v12, %v300_v13  ;;  %v160_v18 = vld [vmem:[#allocation5 + $0x340] sm:$0xff]  ;;  %3216 = vmatprep.subr.bf16.mxu0 %v3999_v16  ;;  %v4126_v23 = vcombine.low %v296_v12, %v300_v13  ;;  %v4550_v16 = vcombine.low %v4534_v53, %v4534_v53 }
  0x4f   :  { %v164_v19 = vld [vmem:[#allocation5 + $0x360] sm:$0xff]  ;;  %3217 = vmatpush2.bf16.msra.mxu0 %v3998_v22  ;;  %v4558_v22 = vld [vmem:[#allocation2 + $0x18] sm:$0xff] }
  0x50   :  { %v288_v20 = vld [vmem:[#allocation5 + $0x740] sm:$0xff]  ;;  %v3991_v24 = vcombine.high %v160_v18, %v164_v19  ;;  %3257 = vmatprep.subr.bf16.mxu1 %v4127_v17  ;;  %v3990_v30 = vcombine.low %v160_v18, %v164_v19  ;;  %v4552_v19 = vld [vmem:[#allocation2 + $0x10] sm:$0xff] }
  0x51   :  { %v292_v21 = vld [vmem:[#allocation5 + $0x760] sm:$0xff]  ;;  %3258 = vmatpush2.bf16.msra.mxu1 %v4126_v23 }
  0x52   :  { %v4119_v25 = vcombine.high %v288_v20, %v292_v21  ;;  %v152_v26 = vld [vmem:[#allocation5 + $0x300] sm:$0xff]  ;;  %3218 = vmatprep.subr.bf16.mxu0 %v3991_v24  ;;  %v4118_v31 = vcombine.low %v288_v20, %v292_v21  ;;  %v4556_v20 = vcombine.low %v4536_v54, %v4536_v54 }
  0x53   :  { %v156_v27 = vld [vmem:[#allocation5 + $0x320] sm:$0xff]  ;;  %3219 = vmatpush2.bf16.msra.mxu0 %v3990_v30 }
  0x54   :  { %v280_v28 = vld [vmem:[#allocation5 + $0x700] sm:$0xff]  ;;  %v3983_v32 = vcombine.high %v152_v26, %v156_v27  ;;  %3259 = vmatprep.subr.bf16.mxu1 %v4119_v25  ;;  %v3982_v38 = vcombine.low %v152_v26, %v156_v27  ;;  %v4562_v27 = vcombine.high %v4552_v19, %v4552_v19 }
  0x55   :  { %v284_v29 = vld [vmem:[#allocation5 + $0x720] sm:$0xff]  ;;  %3260 = vmatpush2.bf16.msra.mxu1 %v4118_v31 }
  0x56   :  { %v4111_v33 = vcombine.high %v280_v28, %v284_v29  ;;  %v144_v34 = vld [vmem:[#allocation5 + $0x2c0] sm:$0xff]  ;;  %3220 = vmatprep.subr.bf16.mxu0 %v3983_v32  ;;  %v4110_v39 = vcombine.low %v280_v28, %v284_v29  ;;  %v4567_v29 = vcombine.high %v4558_v22, %v4558_v22 }
  0x57   :  { %v148_v35 = vld [vmem:[#allocation5 + $0x2e0] sm:$0xff]  ;;  %3221 = vmatpush2.bf16.msra.mxu0 %v3982_v38 }
  0x58   :  { %v272_v36 = vld [vmem:[#allocation5 + $0x6c0] sm:$0xff]  ;;  %v3975_v40 = vcombine.high %v144_v34, %v148_v35  ;;  %3261 = vmatprep.subr.bf16.mxu1 %v4111_v33  ;;  %v3974_v46 = vcombine.low %v144_v34, %v148_v35 }
  0x59   :  { %v276_v37 = vld [vmem:[#allocation5 + $0x6e0] sm:$0xff]  ;;  %3262 = vmatpush2.bf16.msra.mxu1 %v4110_v39 }
  0x5a   :  { %v4103_v41 = vcombine.high %v272_v36, %v276_v37  ;;  %v136_v42 = vld [vmem:[#allocation5 + $0x280] sm:$0xff]  ;;  %3222 = vmatprep.subr.bf16.mxu0 %v3975_v40  ;;  %v4102_v47 = vcombine.low %v272_v36, %v276_v37 }
  0x5b   :  { %v140_v43 = vld [vmem:[#allocation5 + $0x2a0] sm:$0xff]  ;;  %3223 = vmatpush2.bf16.msra.mxu0 %v3974_v46 }
  0x5c   :  { %v264_v44 = vld [vmem:[#allocation5 + $0x680] sm:$0xff]  ;;  %v3967_v48 = vcombine.high %v136_v42, %v140_v43  ;;  %3263 = vmatprep.subr.bf16.mxu1 %v4103_v41  ;;  %v3966_v56 = vcombine.low %v136_v42, %v140_v43 }
  0x5d   :  { %v268_v45 = vld [vmem:[#allocation5 + $0x6a0] sm:$0xff]  ;;  %3264 = vmatpush2.bf16.msra.mxu1 %v4102_v47 }
  0x5e   :  { %v4095_v49 = vcombine.high %v264_v44, %v268_v45  ;;  %v128_v50 = vld [vmem:[#allocation5 + $0x240] sm:$0xff]  ;;  %3224 = vmatprep.subr.bf16.mxu0 %v3967_v48  ;;  %v4094_v57 = vcombine.low %v264_v44, %v268_v45 }
  0x5f   :  { %v132_v51 = vld [vmem:[#allocation5 + $0x260] sm:$0xff]  ;;  %3225 = vmatpush2.bf16.msra.mxu0 %v3966_v56 }
  0x60   :  { %v256_v52 = vld [vmem:[#allocation5 + $0x640] sm:$0xff]  ;;  %v3959_v60 = vcombine.high %v128_v50, %v132_v51  ;;  %3265 = vmatprep.subr.bf16.mxu1 %v4095_v49  ;;  %v3958_v2 = vcombine.low %v128_v50, %v132_v51 }
  0x61   :  { %v260_v55 = vld [vmem:[#allocation5 + $0x660] sm:$0xff]  ;;  %3266 = vmatpush2.bf16.msra.mxu1 %v4094_v57 }
  0x62   :  { %v4087_v61 = vcombine.high %v256_v52, %v260_v55  ;;  %v120_v62 = vld [vmem:[#allocation5 + $0x200] sm:$0xff]  ;;  %3226 = vmatprep.subr.bf16.mxu0 %v3959_v60  ;;  %v4086_v3 = vcombine.low %v256_v52, %v260_v55 }
  0x63   :  { %v124_v63 = vld [vmem:[#allocation5 + $0x220] sm:$0xff]  ;;  %3227 = vmatpush2.bf16.msra.mxu0 %v3958_v2 }
  0x64   :  { %v248_v0 = vld [vmem:[#allocation5 + $0x600] sm:$0xff]  ;;  %v3951_v4 = vcombine.high %v120_v62, %v124_v63  ;;  %3267 = vmatprep.subr.bf16.mxu1 %v4087_v61  ;;  %v3950_v10 = vcombine.low %v120_v62, %v124_v63 }
  0x65   :  { %v252_v1 = vld [vmem:[#allocation5 + $0x620] sm:$0xff]  ;;  %3268 = vmatpush2.bf16.msra.mxu1 %v4086_v3 }
  0x66   :  { %v4079_v5 = vcombine.high %v248_v0, %v252_v1  ;;  %v368_v6 = vld [vmem:[#allocation5 + $0x9c0] sm:$0xff]  ;;  %3228 = vmatprep.subr.bf16.mxu0 %v3951_v4  ;;  %v4078_v11 = vcombine.low %v248_v0, %v252_v1 }
  0x67   :  { %v372_v7 = vld [vmem:[#allocation5 + $0x9e0] sm:$0xff]  ;;  %3229 = vmatpush2.bf16.msra.mxu0 %v3950_v10 }
  0x68   :  { %v496_v8 = vld [vmem:[#allocation5 + $0xdc0] sm:$0xff]  ;;  %v4199_v12 = vcombine.high %v368_v6, %v372_v7  ;;  %3269 = vmatprep.subr.bf16.mxu1 %v4079_v5  ;;  %v4198_v21 = vcombine.low %v368_v6, %v372_v7 }
  0x69   :  { %v500_v9 = vld [vmem:[#allocation5 + $0xde0] sm:$0xff]  ;;  %3270 = vmatpush2.bf16.msra.mxu1 %v4078_v11 }
  0x6a   :  { %v4327_v13 = vcombine.high %v496_v8, %v500_v9  ;;  %v360_v14 = vld [vmem:[#allocation5 + $0x980] sm:$0xff]  ;;  %3280 = vmatprep.subr.bf16.mxu0 %v4199_v12  ;;  %v4326_v23 = vcombine.low %v496_v8, %v500_v9  ;;  %3231 = vmatmul.mubr.bf16.vlgmr.msra.gmra.mxu0 %v4550_v16 }
  0x6b   :  { %v364_v15 = vld [vmem:[#allocation5 + $0x9a0] sm:$0xff]  ;;  %3281 = vmatpush1.bf16.msra.mxu0 %v4198_v21  ;;  %3312 = vmatprep.mubr.bf16.mxu0 %v4562_v27 }
  0x6c   :  { %v488_v17 = vld [vmem:[#allocation5 + $0xd80] sm:$0xff]  ;;  %v4191_v24 = vcombine.high %v360_v14, %v364_v15  ;;  %3321 = vmatprep.subr.bf16.mxu1 %v4327_v13  ;;  %3272 = vmatmul.mubr.bf16.vlgmr.msra.gmra.mxu1 %v4556_v20  ;;  %v4190_v30 = vcombine.low %v360_v14, %v364_v15 }
  0x6d   :  { %v492_v18 = vld [vmem:[#allocation5 + $0xda0] sm:$0xff]  ;;  %3322 = vmatpush1.bf16.msra.mxu1 %v4326_v23  ;;  %3353 = vmatprep.mubr.bf16.mxu1 %v4567_v29 }
  0x6e   :  { %v4319_v25 = vcombine.high %v488_v17, %v492_v18  ;;  %v352_v53 = vld [vmem:[#allocation5 + $0x940] sm:$0xff]  ;;  %3282 = vmatprep.subr.bf16.mxu0 %v4191_v24  ;;  %v4318_v31 = vcombine.low %v488_v17, %v492_v18 }
  0x6f   :  { %v356_v26 = vld [vmem:[#allocation5 + $0x960] sm:$0xff]  ;;  %3283 = vmatpush1.bf16.msra.mxu0 %v4190_v30 }
  0x70   :  { %v480_v28 = vld [vmem:[#allocation5 + $0xd40] sm:$0xff]  ;;  %v4183_v32 = vcombine.high %v352_v53, %v356_v26  ;;  %3323 = vmatprep.subr.bf16.mxu1 %v4319_v25  ;;  %v4182_v38 = vcombine.low %v352_v53, %v356_v26 }
  0x71   :  { %v484_v54 = vld [vmem:[#allocation5 + $0xd60] sm:$0xff]  ;;  %3324 = vmatpush1.bf16.msra.mxu1 %v4318_v31 }
  0x72   :  { %v4311_v33 = vcombine.high %v480_v28, %v484_v54  ;;  %v344_v34 = vld [vmem:[#allocation5 + $0x900] sm:$0xff]  ;;  %3284 = vmatprep.subr.bf16.mxu0 %v4183_v32  ;;  %v4310_v39 = vcombine.low %v480_v28, %v484_v54 }
  0x73   :  { %v348_v35 = vld [vmem:[#allocation5 + $0x920] sm:$0xff]  ;;  %3285 = vmatpush1.bf16.msra.mxu0 %v4182_v38 }
  0x74   :  { %v472_v36 = vld [vmem:[#allocation5 + $0xd00] sm:$0xff]  ;;  %v4175_v40 = vcombine.high %v344_v34, %v348_v35  ;;  %3325 = vmatprep.subr.bf16.mxu1 %v4311_v33  ;;  %v4174_v46 = vcombine.low %v344_v34, %v348_v35 }
  0x75   :  { %v476_v37 = vld [vmem:[#allocation5 + $0xd20] sm:$0xff]  ;;  %3326 = vmatpush1.bf16.msra.mxu1 %v4310_v39 }
  0x76   :  { %v4303_v41 = vcombine.high %v472_v36, %v476_v37  ;;  %v336_v42 = vld [vmem:[#allocation5 + $0x8c0] sm:$0xff]  ;;  %3286 = vmatprep.subr.bf16.mxu0 %v4175_v40  ;;  %v4302_v47 = vcombine.low %v472_v36, %v476_v37 }
  0x77   :  { %v340_v43 = vld [vmem:[#allocation5 + $0x8e0] sm:$0xff]  ;;  %3287 = vmatpush1.bf16.msra.mxu0 %v4174_v46 }
  0x78   :  { %v464_v44 = vld [vmem:[#allocation5 + $0xcc0] sm:$0xff]  ;;  %v4167_v48 = vcombine.high %v336_v42, %v340_v43  ;;  %3327 = vmatprep.subr.bf16.mxu1 %v4303_v41  ;;  %v4166_v56 = vcombine.low %v336_v42, %v340_v43 }
  0x79   :  { %v468_v45 = vld [vmem:[#allocation5 + $0xce0] sm:$0xff]  ;;  %3328 = vmatpush1.bf16.msra.mxu1 %v4302_v47 }
  0x7a   :  { %v4295_v49 = vcombine.high %v464_v44, %v468_v45  ;;  %v328_v50 = vld [vmem:[#allocation5 + $0x880] sm:$0xff]  ;;  %3288 = vmatprep.subr.bf16.mxu0 %v4167_v48  ;;  %v4294_v57 = vcombine.low %v464_v44, %v468_v45 }
  0x7b   :  { %v332_v51 = vld [vmem:[#allocation5 + $0x8a0] sm:$0xff]  ;;  %3289 = vmatpush1.bf16.msra.mxu0 %v4166_v56 }
  0x7c   :  { %v456_v52 = vld [vmem:[#allocation5 + $0xc80] sm:$0xff]  ;;  %v4159_v60 = vcombine.high %v328_v50, %v332_v51  ;;  %3329 = vmatprep.subr.bf16.mxu1 %v4295_v49  ;;  %v4158_v2 = vcombine.low %v328_v50, %v332_v51 }
  0x7d   :  { %v460_v55 = vld [vmem:[#allocation5 + $0xca0] sm:$0xff]  ;;  %3330 = vmatpush1.bf16.msra.mxu1 %v4294_v57 }
  0x7e   :  { %v4287_v61 = vcombine.high %v456_v52, %v460_v55  ;;  %v320_v62 = vld [vmem:[#allocation5 + $0x840] sm:$0xff]  ;;  %3290 = vmatprep.subr.bf16.mxu0 %v4159_v60  ;;  %v4286_v3 = vcombine.low %v456_v52, %v460_v55 }
  0x7f   :  { %v324_v63 = vld [vmem:[#allocation5 + $0x860] sm:$0xff]  ;;  %3291 = vmatpush1.bf16.msra.mxu0 %v4158_v2 }
  0x80   :  { %v448_v0 = vld [vmem:[#allocation5 + $0xc40] sm:$0xff]  ;;  %v4151_v4 = vcombine.high %v320_v62, %v324_v63  ;;  %3331 = vmatprep.subr.bf16.mxu1 %v4287_v61  ;;  %v4150_v10 = vcombine.low %v320_v62, %v324_v63 }
  0x81   :  { %v452_v1 = vld [vmem:[#allocation5 + $0xc60] sm:$0xff]  ;;  %3332 = vmatpush1.bf16.msra.mxu1 %v4286_v3 }
  0x82   :  { %v4279_v5 = vcombine.high %v448_v0, %v452_v1  ;;  %v312_v6 = vld [vmem:[#allocation5 + $0x800] sm:$0xff]  ;;  %3292 = vmatprep.subr.bf16.mxu0 %v4151_v4  ;;  %v4278_v11 = vcombine.low %v448_v0, %v452_v1 }
  0x83   :  { %v316_v7 = vld [vmem:[#allocation5 + $0x820] sm:$0xff]  ;;  %3293 = vmatpush1.bf16.msra.mxu0 %v4150_v10 }
  0x84   :  { %v440_v8 = vld [vmem:[#allocation5 + $0xc00] sm:$0xff]  ;;  %v4143_v12 = vcombine.high %v312_v6, %v316_v7  ;;  %3333 = vmatprep.subr.bf16.mxu1 %v4279_v5  ;;  %v4142_v21 = vcombine.low %v312_v6, %v316_v7 }
  0x85   :  { %v444_v9 = vld [vmem:[#allocation5 + $0xc20] sm:$0xff]  ;;  %3334 = vmatpush1.bf16.msra.mxu1 %v4278_v11 }
  0x86   :  { %v4271_v13 = vcombine.high %v440_v8, %v444_v9  ;;  %v432_v14 = vld [vmem:[#allocation5 + $0xbc0] sm:$0xff]  ;;  %3294 = vmatprep.subr.bf16.mxu0 %v4143_v12  ;;  %v4270_v23 = vcombine.low %v440_v8, %v444_v9 }
  0x87   :  { %v436_v15 = vld [vmem:[#allocation5 + $0xbe0] sm:$0xff]  ;;  %3295 = vmatpush1.bf16.msra.mxu0 %v4142_v21 }
  0x88   :  { %v560_v17 = vld [vmem:[#allocation5 + $0xfc0] sm:$0xff]  ;;  %v4263_v24 = vcombine.high %v432_v14, %v436_v15  ;;  %3335 = vmatprep.subr.bf16.mxu1 %v4271_v13  ;;  %v4262_v30 = vcombine.low %v432_v14, %v436_v15 }
  0x89   :  { %v564_v18 = vld [vmem:[#allocation5 + $0xfe0] sm:$0xff]  ;;  %3336 = vmatpush1.bf16.msra.mxu1 %v4270_v23 }
  0x8a   :  { %v4391_v25 = vcombine.high %v560_v17, %v564_v18  ;;  %v424_v53 = vld [vmem:[#allocation5 + $0xb80] sm:$0xff]  ;;  %3296 = vmatprep.subr.bf16.mxu0 %v4263_v24  ;;  %v4390_v31 = vcombine.low %v560_v17, %v564_v18 }
  0x8b   :  { %v428_v26 = vld [vmem:[#allocation5 + $0xba0] sm:$0xff]  ;;  %3297 = vmatpush2.bf16.msra.mxu0 %v4262_v30 }
  0x8c   :  { %v552_v28 = vld [vmem:[#allocation5 + $0xf80] sm:$0xff]  ;;  %v4255_v32 = vcombine.high %v424_v53, %v428_v26  ;;  %3337 = vmatprep.subr.bf16.mxu1 %v4391_v25  ;;  %v4254_v38 = vcombine.low %v424_v53, %v428_v26  ;;  %v113_v53 = vld [vmem:[#allocation5 + $0x1c8] sm:$0xff] }
  0x8d   :  { %v556_v54 = vld [vmem:[#allocation5 + $0xfa0] sm:$0xff]  ;;  %3338 = vmatpush2.bf16.msra.mxu1 %v4390_v31  ;;  %v117_v26 = vld [vmem:[#allocation5 + $0x1e8] sm:$0xff] }
  0x8e   :  { %v4383_v33 = vcombine.high %v552_v28, %v556_v54  ;;  %v416_v34 = vld [vmem:[#allocation5 + $0xb40] sm:$0xff]  ;;  %3298 = vmatprep.subr.bf16.mxu0 %v4255_v32  ;;  %v4382_v39 = vcombine.low %v552_v28, %v556_v54  ;;  %v241_v28 = vld [vmem:[#allocation5 + $0x5c8] sm:$0xff]  ;;  %v3945_v32 = vcombine.high %v113_v53, %v117_v26 }
  0x8f   :  { %v420_v35 = vld [vmem:[#allocation5 + $0xb60] sm:$0xff]  ;;  %3299 = vmatpush2.bf16.msra.mxu0 %v4254_v38  ;;  %v245_v54 = vld [vmem:[#allocation5 + $0x5e8] sm:$0xff] }
  0x90   :  { %v544_v36 = vld [vmem:[#allocation5 + $0xf40] sm:$0xff]  ;;  %v4247_v40 = vcombine.high %v416_v34, %v420_v35  ;;  %3339 = vmatprep.subr.bf16.mxu1 %v4383_v33  ;;  %v4246_v46 = vcombine.low %v416_v34, %v420_v35  ;;  %v4073_v33 = vcombine.high %v241_v28, %v245_v54  ;;  %v105_v34 = vld [vmem:[#allocation5 + $0x188] sm:$0xff] }
  0x91   :  { %v548_v37 = vld [vmem:[#allocation5 + $0xf60] sm:$0xff]  ;;  %3340 = vmatpush2.bf16.msra.mxu1 %v4382_v39  ;;  %v109_v35 = vld [vmem:[#allocation5 + $0x1a8] sm:$0xff]  ;;  %v4578_v39 = vcombine.low %v4558_v22, %v4558_v22 }
  0x92   :  { %v4375_v41 = vcombine.high %v544_v36, %v548_v37  ;;  %v408_v42 = vld [vmem:[#allocation5 + $0xb00] sm:$0xff]  ;;  %3300 = vmatprep.subr.bf16.mxu0 %v4247_v40  ;;  %v4374_v47 = vcombine.low %v544_v36, %v548_v37  ;;  %v4574_v36 = vcombine.low %v4552_v19, %v4552_v19  ;;  %v233_v37 = vld [vmem:[#allocation5 + $0x588] sm:$0xff]  ;;  %v3944_v40 = vcombine.low %v113_v53, %v117_v26 }
  0x93   :  { %v412_v43 = vld [vmem:[#allocation5 + $0xb20] sm:$0xff]  ;;  %3301 = vmatpush2.bf16.msra.mxu0 %v4246_v46  ;;  %v237_v38 = vld [vmem:[#allocation5 + $0x5a8] sm:$0xff] }
  0x94   :  { %v536_v44 = vld [vmem:[#allocation5 + $0xf00] sm:$0xff]  ;;  %v4239_v48 = vcombine.high %v408_v42, %v412_v43  ;;  %3341 = vmatprep.subr.bf16.mxu1 %v4375_v41  ;;  %v4238_v56 = vcombine.low %v408_v42, %v412_v43  ;;  %v4072_v41 = vcombine.low %v241_v28, %v245_v54  ;;  %v3937_v42 = vcombine.high %v105_v34, %v109_v35  ;;  %v225_v19 = vld [vmem:[#allocation5 + $0x548] sm:$0xff] }
  0x95   :  { %v540_v45 = vld [vmem:[#allocation5 + $0xf20] sm:$0xff]  ;;  %3342 = vmatpush2.bf16.msra.mxu1 %v4374_v47  ;;  %v4065_v43 = vcombine.high %v233_v37, %v237_v38  ;;  %v229_v46 = vld [vmem:[#allocation5 + $0x568] sm:$0xff]  ;;  %v3936_v47 = vcombine.low %v105_v34, %v109_v35  ;;  %v4064_v22 = vcombine.low %v233_v37, %v237_v38 }
  0x96   :  { %v4367_v49 = vcombine.high %v536_v44, %v540_v45  ;;  %v400_v50 = vld [vmem:[#allocation5 + $0xac0] sm:$0xff]  ;;  %3302 = vmatprep.subr.bf16.mxu0 %v4239_v48  ;;  %v4366_v57 = vcombine.low %v536_v44, %v540_v45  ;;  %v97_v44 = vld [vmem:[#allocation5 + $0x148] sm:$0xff] }
  0x97   :  { %v404_v51 = vld [vmem:[#allocation5 + $0xae0] sm:$0xff]  ;;  %3303 = vmatpush2.bf16.msra.mxu0 %v4238_v56  ;;  %v101_v45 = vld [vmem:[#allocation5 + $0x168] sm:$0xff] }
  0x98   :  { %v528_v52 = vld [vmem:[#allocation5 + $0xec0] sm:$0xff]  ;;  %v4231_v60 = vcombine.high %v400_v50, %v404_v51  ;;  %3343 = vmatprep.subr.bf16.mxu1 %v4367_v49  ;;  %v4230_v2 = vcombine.low %v400_v50, %v404_v51  ;;  %v3929_v48 = vcombine.high %v97_v44, %v101_v45  ;;  %v4057_v49 = vcombine.high %v225_v19, %v229_v46  ;;  %v89_v50 = vld [vmem:[#allocation5 + $0x108] sm:$0xff] }
  0x99   :  { %v532_v55 = vld [vmem:[#allocation5 + $0xee0] sm:$0xff]  ;;  %3344 = vmatpush2.bf16.msra.mxu1 %v4366_v57  ;;  %v93_v51 = vld [vmem:[#allocation5 + $0x128] sm:$0xff]  ;;  %v3928_v56 = vcombine.low %v97_v44, %v101_v45  ;;  %v4056_v57 = vcombine.low %v225_v19, %v229_v46 }
  0x9a   :  { %v4359_v61 = vcombine.high %v528_v52, %v532_v55  ;;  %v392_v62 = vld [vmem:[#allocation5 + $0xa80] sm:$0xff]  ;;  %3304 = vmatprep.subr.bf16.mxu0 %v4231_v60  ;;  %v4358_v3 = vcombine.low %v528_v52, %v532_v55  ;;  %v217_v52 = vld [vmem:[#allocation5 + $0x508] sm:$0xff]  ;;  %v3921_v60 = vcombine.high %v89_v50, %v93_v51 }
  0x9b   :  { %v396_v63 = vld [vmem:[#allocation5 + $0xaa0] sm:$0xff]  ;;  %3305 = vmatpush2.bf16.msra.mxu0 %v4230_v2  ;;  %v221_v55 = vld [vmem:[#allocation5 + $0x528] sm:$0xff]  ;;  %v3920_v2 = vcombine.low %v89_v50, %v93_v51 }
  0x9c   :  { %v520_v0 = vld [vmem:[#allocation5 + $0xe80] sm:$0xff]  ;;  %v4223_v4 = vcombine.high %v392_v62, %v396_v63  ;;  %3345 = vmatprep.subr.bf16.mxu1 %v4359_v61  ;;  %v4222_v10 = vcombine.low %v392_v62, %v396_v63  ;;  %v4049_v61 = vcombine.high %v217_v52, %v221_v55  ;;  %v81_v62 = vld [vmem:[#allocation5 + $0xc8] sm:$0xff] }
  0x9d   :  { %v524_v1 = vld [vmem:[#allocation5 + $0xea0] sm:$0xff]  ;;  %3346 = vmatpush2.bf16.msra.mxu1 %v4358_v3  ;;  %v85_v63 = vld [vmem:[#allocation5 + $0xe8] sm:$0xff]  ;;  %v4048_v3 = vcombine.low %v217_v52, %v221_v55 }
  0x9e   :  { %v4351_v5 = vcombine.high %v520_v0, %v524_v1  ;;  %v384_v6 = vld [vmem:[#allocation5 + $0xa40] sm:$0xff]  ;;  %3306 = vmatprep.subr.bf16.mxu0 %v4223_v4  ;;  %v4350_v11 = vcombine.low %v520_v0, %v524_v1  ;;  %v209_v0 = vld [vmem:[#allocation5 + $0x4c8] sm:$0xff]  ;;  %v3913_v4 = vcombine.high %v81_v62, %v85_v63 }
  0x9f   :  { %v388_v7 = vld [vmem:[#allocation5 + $0xa60] sm:$0xff]  ;;  %3307 = vmatpush2.bf16.msra.mxu0 %v4222_v10  ;;  %v213_v1 = vld [vmem:[#allocation5 + $0x4e8] sm:$0xff]  ;;  %v3912_v10 = vcombine.low %v81_v62, %v85_v63 }
  0xa0   :  { %v512_v8 = vld [vmem:[#allocation5 + $0xe40] sm:$0xff]  ;;  %v4215_v12 = vcombine.high %v384_v6, %v388_v7  ;;  %3347 = vmatprep.subr.bf16.mxu1 %v4351_v5  ;;  %v4214_v21 = vcombine.low %v384_v6, %v388_v7  ;;  %v4041_v5 = vcombine.high %v209_v0, %v213_v1  ;;  %v73_v6 = vld [vmem:[#allocation5 + $0x88] sm:$0xff] }
  0xa1   :  { %v516_v9 = vld [vmem:[#allocation5 + $0xe60] sm:$0xff]  ;;  %3348 = vmatpush2.bf16.msra.mxu1 %v4350_v11  ;;  %v77_v7 = vld [vmem:[#allocation5 + $0xa8] sm:$0xff]  ;;  %v4040_v11 = vcombine.low %v209_v0, %v213_v1 }
  0xa2   :  { %v4343_v13 = vcombine.high %v512_v8, %v516_v9  ;;  %v376_v14 = vld [vmem:[#allocation5 + $0xa00] sm:$0xff]  ;;  %3308 = vmatprep.subr.bf16.mxu0 %v4215_v12  ;;  %v4342_v23 = vcombine.low %v512_v8, %v516_v9  ;;  %v201_v8 = vld [vmem:[#allocation5 + $0x488] sm:$0xff]  ;;  %v3905_v12 = vcombine.high %v73_v6, %v77_v7 }
  0xa3   :  { %v380_v15 = vld [vmem:[#allocation5 + $0xa20] sm:$0xff]  ;;  %3309 = vmatpush2.bf16.msra.mxu0 %v4214_v21  ;;  %v205_v9 = vld [vmem:[#allocation5 + $0x4a8] sm:$0xff]  ;;  %v3904_v21 = vcombine.low %v73_v6, %v77_v7 }
  0xa4   :  { %v504_v17 = vld [vmem:[#allocation5 + $0xe00] sm:$0xff]  ;;  %v4207_v24 = vcombine.high %v376_v14, %v380_v15  ;;  %3349 = vmatprep.subr.bf16.mxu1 %v4343_v13  ;;  %v4206_v30 = vcombine.low %v376_v14, %v380_v15  ;;  %v4033_v13 = vcombine.high %v201_v8, %v205_v9  ;;  %v65_v14 = vld [vmem:[#allocation5 + $0x48] sm:$0xff] }
  0xa5   :  { %v508_v18 = vld [vmem:[#allocation5 + $0xe20] sm:$0xff]  ;;  %3350 = vmatpush2.bf16.msra.mxu1 %v4342_v23  ;;  %v69_v15 = vld [vmem:[#allocation5 + $0x68] sm:$0xff]  ;;  %v4032_v23 = vcombine.low %v201_v8, %v205_v9 }
  0xa6   :  { %v4335_v25 = vcombine.high %v504_v17, %v508_v18  ;;  %3310 = vmatprep.subr.bf16.mxu0 %v4207_v24  ;;  %v4334_v31 = vcombine.low %v504_v17, %v508_v18  ;;  %v193_v17 = vld [vmem:[#allocation5 + $0x448] sm:$0xff]  ;;  %v3897_v24 = vcombine.high %v65_v14, %v69_v15 }
  0xa7   :  { %3311 = vmatpush2.bf16.msra.mxu0 %v4206_v30  ;;  %v197_v18 = vld [vmem:[#allocation5 + $0x468] sm:$0xff]  ;;  %v3896_v30 = vcombine.low %v65_v14, %v69_v15 }
  0xa8   :  { %3351 = vmatprep.subr.bf16.mxu1 %v4335_v25  ;;  %3362 = vmatprep.subr.bf16.mxu0 %v3945_v32  ;;  %v4025_v25 = vcombine.high %v193_v17, %v197_v18  ;;  %v57_v53 = vld [vmem:[#allocation5 + $0x8] sm:$0xff] }
  0xa9   :  { %3352 = vmatpush2.bf16.msra.mxu1 %v4334_v31  ;;  %v61_v26 = vld [vmem:[#allocation5 + $0x28] sm:$0xff]  ;;  %v4024_v31 = vcombine.low %v193_v17, %v197_v18 }
  0xaa   :  { %3403 = vmatprep.subr.bf16.mxu1 %v4073_v33  ;;  %3313 = vmatmul.mubr.bf16.vlgmr.msra.gmra.mxu0 %v4574_v36  ;;  %v185_v28 = vld [vmem:[#allocation5 + $0x408] sm:$0xff]  ;;  %v3889_v32 = vcombine.high %v57_v53, %v61_v26 }
  0xab   :  { %3363 = vmatpush1.bf16.msra.mxu0 %v3944_v40  ;;  %3394 = vmatprep.mubr.bf16.mxu0 %v4540_v58  ;;  %v189_v54 = vld [vmem:[#allocation5 + $0x428] sm:$0xff]  ;;  %v3888_v40 = vcombine.low %v57_v53, %v61_v26 }
  0xac   :  { %3354 = vmatmul.mubr.bf16.vlgmr.msra.gmra.mxu1 %v4578_v39  ;;  %3364 = vmatprep.subr.bf16.mxu0 %v3937_v42  ;;  %v4017_v33 = vcombine.high %v185_v28, %v189_v54  ;;  %v177_v34 = vld [vmem:[#allocation5 + $0x3c8] sm:$0xff] }
  0xad   :  { %3404 = vmatpush1.bf16.msra.mxu1 %v4072_v41  ;;  %3435 = vmatprep.mubr.bf16.mxu1 %v4544_v59  ;;  %v181_v35 = vld [vmem:[#allocation5 + $0x3e8] sm:$0xff]  ;;  %v4016_v41 = vcombine.low %v185_v28, %v189_v54 }
  0xae   :  { %3405 = vmatprep.subr.bf16.mxu1 %v4065_v43  ;;  %v305_v37 = vld [vmem:[#allocation5 + $0x7c8] sm:$0xff]  ;;  %v4009_v42 = vcombine.high %v177_v34, %v181_v35 }
  0xaf   :  { %3365 = vmatpush1.bf16.msra.mxu0 %v3936_v47  ;;  %v309_v38 = vld [vmem:[#allocation5 + $0x7e8] sm:$0xff]  ;;  %v4008_v47 = vcombine.low %v177_v34, %v181_v35 }
  0xb0   :  { %3366 = vmatprep.subr.bf16.mxu0 %v3929_v48  ;;  %v4137_v43 = vcombine.high %v305_v37, %v309_v38  ;;  %v169_v44 = vld [vmem:[#allocation5 + $0x388] sm:$0xff] }
  0xb1   :  { %3406 = vmatpush1.bf16.msra.mxu1 %v4064_v22  ;;  %v173_v45 = vld [vmem:[#allocation5 + $0x3a8] sm:$0xff]  ;;  %v4136_v22 = vcombine.low %v305_v37, %v309_v38 }
  0xb2   :  { %3407 = vmatprep.subr.bf16.mxu1 %v4057_v49  ;;  %v297_v19 = vld [vmem:[#allocation5 + $0x788] sm:$0xff]  ;;  %v4001_v48 = vcombine.high %v169_v44, %v173_v45 }
  0xb3   :  { %3367 = vmatpush1.bf16.msra.mxu0 %v3928_v56  ;;  %v301_v46 = vld [vmem:[#allocation5 + $0x7a8] sm:$0xff]  ;;  %v4000_v56 = vcombine.low %v169_v44, %v173_v45 }
  0xb4   :  { %3368 = vmatprep.subr.bf16.mxu0 %v3921_v60  ;;  %v4129_v49 = vcombine.high %v297_v19, %v301_v46  ;;  %v161_v50 = vld [vmem:[#allocation5 + $0x348] sm:$0xff] }
  0xb5   :  { %3408 = vmatpush1.bf16.msra.mxu1 %v4056_v57  ;;  %v165_v51 = vld [vmem:[#allocation5 + $0x368] sm:$0xff]  ;;  %v4128_v57 = vcombine.low %v297_v19, %v301_v46 }
  0xb6   :  { %3409 = vmatprep.subr.bf16.mxu1 %v4049_v61  ;;  %v289_v52 = vld [vmem:[#allocation5 + $0x748] sm:$0xff]  ;;  %v3993_v60 = vcombine.high %v161_v50, %v165_v51 }
  0xb7   :  { %3369 = vmatpush1.bf16.msra.mxu0 %v3920_v2  ;;  %v293_v55 = vld [vmem:[#allocation5 + $0x768] sm:$0xff]  ;;  %v3992_v2 = vcombine.low %v161_v50, %v165_v51 }
  0xb8   :  { %3370 = vmatprep.subr.bf16.mxu0 %v3913_v4  ;;  %v4121_v61 = vcombine.high %v289_v52, %v293_v55  ;;  %v153_v62 = vld [vmem:[#allocation5 + $0x308] sm:$0xff] }
  0xb9   :  { %3410 = vmatpush1.bf16.msra.mxu1 %v4048_v3  ;;  %v157_v63 = vld [vmem:[#allocation5 + $0x328] sm:$0xff]  ;;  %v4120_v3 = vcombine.low %v289_v52, %v293_v55 }
  0xba   :  { %3411 = vmatprep.subr.bf16.mxu1 %v4041_v5  ;;  %v281_v0 = vld [vmem:[#allocation5 + $0x708] sm:$0xff]  ;;  %v3985_v4 = vcombine.high %v153_v62, %v157_v63 }
  0xbb   :  { %3371 = vmatpush1.bf16.msra.mxu0 %v3912_v10  ;;  %v285_v1 = vld [vmem:[#allocation5 + $0x728] sm:$0xff]  ;;  %v3984_v10 = vcombine.low %v153_v62, %v157_v63 }
  0xbc   :  { %3372 = vmatprep.subr.bf16.mxu0 %v3905_v12  ;;  %v4113_v5 = vcombine.high %v281_v0, %v285_v1  ;;  %v145_v6 = vld [vmem:[#allocation5 + $0x2c8] sm:$0xff] }
  0xbd   :  { %3412 = vmatpush1.bf16.msra.mxu1 %v4040_v11  ;;  %v149_v7 = vld [vmem:[#allocation5 + $0x2e8] sm:$0xff]  ;;  %v4112_v11 = vcombine.low %v281_v0, %v285_v1 }
  0xbe   :  { %3413 = vmatprep.subr.bf16.mxu1 %v4033_v13  ;;  %v273_v8 = vld [vmem:[#allocation5 + $0x6c8] sm:$0xff]  ;;  %v3977_v12 = vcombine.high %v145_v6, %v149_v7 }
  0xbf   :  { %3373 = vmatpush1.bf16.msra.mxu0 %v3904_v21  ;;  %v277_v9 = vld [vmem:[#allocation5 + $0x6e8] sm:$0xff]  ;;  %v3976_v21 = vcombine.low %v145_v6, %v149_v7 }
  0xc0   :  { %3374 = vmatprep.subr.bf16.mxu0 %v3897_v24  ;;  %v4105_v13 = vcombine.high %v273_v8, %v277_v9  ;;  %v137_v14 = vld [vmem:[#allocation5 + $0x288] sm:$0xff] }
  0xc1   :  { %3414 = vmatpush1.bf16.msra.mxu1 %v4032_v23  ;;  %v141_v15 = vld [vmem:[#allocation5 + $0x2a8] sm:$0xff]  ;;  %v4104_v23 = vcombine.low %v273_v8, %v277_v9 }
  0xc2   :  { %3415 = vmatprep.subr.bf16.mxu1 %v4025_v25  ;;  %v265_v17 = vld [vmem:[#allocation5 + $0x688] sm:$0xff]  ;;  %v3969_v24 = vcombine.high %v137_v14, %v141_v15 }
  0xc3   :  { %3375 = vmatpush1.bf16.msra.mxu0 %v3896_v30  ;;  %v269_v18 = vld [vmem:[#allocation5 + $0x6a8] sm:$0xff]  ;;  %v3968_v30 = vcombine.low %v137_v14, %v141_v15 }
  0xc4   :  { %3376 = vmatprep.subr.bf16.mxu0 %v3889_v32  ;;  %v4097_v25 = vcombine.high %v265_v17, %v269_v18  ;;  %v129_v53 = vld [vmem:[#allocation5 + $0x248] sm:$0xff] }
  0xc5   :  { %3416 = vmatpush1.bf16.msra.mxu1 %v4024_v31  ;;  %v133_v26 = vld [vmem:[#allocation5 + $0x268] sm:$0xff]  ;;  %v4096_v31 = vcombine.low %v265_v17, %v269_v18 }
  0xc6   :  { %3417 = vmatprep.subr.bf16.mxu1 %v4017_v33  ;;  %v257_v28 = vld [vmem:[#allocation5 + $0x648] sm:$0xff]  ;;  %v3961_v32 = vcombine.high %v129_v53, %v133_v26 }
  0xc7   :  { %3377 = vmatpush1.bf16.msra.mxu0 %v3888_v40  ;;  %v261_v54 = vld [vmem:[#allocation5 + $0x668] sm:$0xff]  ;;  %v3960_v40 = vcombine.low %v129_v53, %v133_v26 }
  0xc8   :  { %3378 = vmatprep.subr.bf16.mxu0 %v4009_v42  ;;  %v4089_v33 = vcombine.high %v257_v28, %v261_v54  ;;  %v121_v34 = vld [vmem:[#allocation5 + $0x208] sm:$0xff] }
  0xc9   :  { %3418 = vmatpush1.bf16.msra.mxu1 %v4016_v41  ;;  %v125_v35 = vld [vmem:[#allocation5 + $0x228] sm:$0xff]  ;;  %v4088_v41 = vcombine.low %v257_v28, %v261_v54 }
  0xca   :  { %3419 = vmatprep.subr.bf16.mxu1 %v4137_v43  ;;  %v249_v37 = vld [vmem:[#allocation5 + $0x608] sm:$0xff]  ;;  %v3953_v42 = vcombine.high %v121_v34, %v125_v35 }
  0xcb   :  { %3379 = vmatpush2.bf16.msra.mxu0 %v4008_v47  ;;  %v253_v38 = vld [vmem:[#allocation5 + $0x628] sm:$0xff]  ;;  %v3952_v47 = vcombine.low %v121_v34, %v125_v35 }
  0xcc   :  { %3380 = vmatprep.subr.bf16.mxu0 %v4001_v48  ;;  %v4081_v43 = vcombine.high %v249_v37, %v253_v38  ;;  %v369_v44 = vld [vmem:[#allocation5 + $0x9c8] sm:$0xff] }
  0xcd   :  { %3420 = vmatpush2.bf16.msra.mxu1 %v4136_v22  ;;  %v373_v45 = vld [vmem:[#allocation5 + $0x9e8] sm:$0xff]  ;;  %v4080_v22 = vcombine.low %v249_v37, %v253_v38 }
  0xce   :  { %3421 = vmatprep.subr.bf16.mxu1 %v4129_v49  ;;  %v497_v19 = vld [vmem:[#allocation5 + $0xdc8] sm:$0xff]  ;;  %v4201_v48 = vcombine.high %v369_v44, %v373_v45 }
  0xcf   :  { %3381 = vmatpush2.bf16.msra.mxu0 %v4000_v56  ;;  %v501_v46 = vld [vmem:[#allocation5 + $0xde8] sm:$0xff]  ;;  %v4200_v56 = vcombine.low %v369_v44, %v373_v45 }
  0xd0   :  { %3382 = vmatprep.subr.bf16.mxu0 %v3993_v60  ;;  %v4329_v49 = vcombine.high %v497_v19, %v501_v46  ;;  %v361_v50 = vld [vmem:[#allocation5 + $0x988] sm:$0xff] }
  0xd1   :  { %3422 = vmatpush2.bf16.msra.mxu1 %v4128_v57  ;;  %v365_v51 = vld [vmem:[#allocation5 + $0x9a8] sm:$0xff]  ;;  %v4328_v57 = vcombine.low %v497_v19, %v501_v46 }
  0xd2   :  { %3423 = vmatprep.subr.bf16.mxu1 %v4121_v61  ;;  %v489_v52 = vld [vmem:[#allocation5 + $0xd88] sm:$0xff]  ;;  %v4193_v60 = vcombine.high %v361_v50, %v365_v51 }
  0xd3   :  { %3383 = vmatpush2.bf16.msra.mxu0 %v3992_v2  ;;  %v493_v55 = vld [vmem:[#allocation5 + $0xda8] sm:$0xff]  ;;  %v4192_v2 = vcombine.low %v361_v50, %v365_v51 }
  0xd4   :  { %3384 = vmatprep.subr.bf16.mxu0 %v3985_v4  ;;  %v4321_v61 = vcombine.high %v489_v52, %v493_v55  ;;  %v353_v62 = vld [vmem:[#allocation5 + $0x948] sm:$0xff] }
  0xd5   :  { %3424 = vmatpush2.bf16.msra.mxu1 %v4120_v3  ;;  %v357_v63 = vld [vmem:[#allocation5 + $0x968] sm:$0xff]  ;;  %v4320_v3 = vcombine.low %v489_v52, %v493_v55 }
  0xd6   :  { %3425 = vmatprep.subr.bf16.mxu1 %v4113_v5  ;;  %v481_v0 = vld [vmem:[#allocation5 + $0xd48] sm:$0xff]  ;;  %v4185_v4 = vcombine.high %v353_v62, %v357_v63 }
  0xd7   :  { %3385 = vmatpush2.bf16.msra.mxu0 %v3984_v10  ;;  %v485_v1 = vld [vmem:[#allocation5 + $0xd68] sm:$0xff]  ;;  %v4184_v10 = vcombine.low %v353_v62, %v357_v63 }
  0xd8   :  { %3386 = vmatprep.subr.bf16.mxu0 %v3977_v12  ;;  %v4313_v5 = vcombine.high %v481_v0, %v485_v1  ;;  %v345_v6 = vld [vmem:[#allocation5 + $0x908] sm:$0xff] }
  0xd9   :  { %3426 = vmatpush2.bf16.msra.mxu1 %v4112_v11  ;;  %v349_v7 = vld [vmem:[#allocation5 + $0x928] sm:$0xff]  ;;  %v4312_v11 = vcombine.low %v481_v0, %v485_v1 }
  0xda   :  { %3427 = vmatprep.subr.bf16.mxu1 %v4105_v13  ;;  %v473_v8 = vld [vmem:[#allocation5 + $0xd08] sm:$0xff]  ;;  %v4177_v12 = vcombine.high %v345_v6, %v349_v7 }
  0xdb   :  { %3387 = vmatpush2.bf16.msra.mxu0 %v3976_v21  ;;  %v477_v9 = vld [vmem:[#allocation5 + $0xd28] sm:$0xff]  ;;  %v4176_v21 = vcombine.low %v345_v6, %v349_v7 }
  0xdc   :  { %3388 = vmatprep.subr.bf16.mxu0 %v3969_v24  ;;  %v4305_v13 = vcombine.high %v473_v8, %v477_v9  ;;  %v337_v14 = vld [vmem:[#allocation5 + $0x8c8] sm:$0xff] }
  0xdd   :  { %3428 = vmatpush2.bf16.msra.mxu1 %v4104_v23  ;;  %v341_v15 = vld [vmem:[#allocation5 + $0x8e8] sm:$0xff]  ;;  %v4304_v23 = vcombine.low %v473_v8, %v477_v9 }
  0xde   :  { %3429 = vmatprep.subr.bf16.mxu1 %v4097_v25  ;;  %v465_v17 = vld [vmem:[#allocation5 + $0xcc8] sm:$0xff]  ;;  %v4169_v24 = vcombine.high %v337_v14, %v341_v15 }
  0xdf   :  { %3389 = vmatpush2.bf16.msra.mxu0 %v3968_v30  ;;  %v469_v18 = vld [vmem:[#allocation5 + $0xce8] sm:$0xff]  ;;  %v4168_v30 = vcombine.low %v337_v14, %v341_v15 }
  0xe0   :  { %3390 = vmatprep.subr.bf16.mxu0 %v3961_v32  ;;  %v4297_v25 = vcombine.high %v465_v17, %v469_v18  ;;  %v329_v53 = vld [vmem:[#allocation5 + $0x888] sm:$0xff] }
  0xe1   :  { %3430 = vmatpush2.bf16.msra.mxu1 %v4096_v31  ;;  %v333_v26 = vld [vmem:[#allocation5 + $0x8a8] sm:$0xff]  ;;  %v4296_v31 = vcombine.low %v465_v17, %v469_v18 }
  0xe2   :  { %3431 = vmatprep.subr.bf16.mxu1 %v4089_v33  ;;  %v457_v28 = vld [vmem:[#allocation5 + $0xc88] sm:$0xff]  ;;  %v4161_v32 = vcombine.high %v329_v53, %v333_v26 }
  0xe3   :  { %3391 = vmatpush2.bf16.msra.mxu0 %v3960_v40  ;;  %v461_v54 = vld [vmem:[#allocation5 + $0xca8] sm:$0xff]  ;;  %v4160_v40 = vcombine.low %v329_v53, %v333_v26 }
  0xe4   :  { %3392 = vmatprep.subr.bf16.mxu0 %v3953_v42  ;;  %v4289_v33 = vcombine.high %v457_v28, %v461_v54  ;;  %v321_v34 = vld [vmem:[#allocation5 + $0x848] sm:$0xff] }
  0xe5   :  { %3432 = vmatpush2.bf16.msra.mxu1 %v4088_v41  ;;  %v325_v35 = vld [vmem:[#allocation5 + $0x868] sm:$0xff]  ;;  %v4288_v41 = vcombine.low %v457_v28, %v461_v54 }
  0xe6   :  { %3433 = vmatprep.subr.bf16.mxu1 %v4081_v43  ;;  %v449_v37 = vld [vmem:[#allocation5 + $0xc48] sm:$0xff]  ;;  %v4153_v42 = vcombine.high %v321_v34, %v325_v35 }
  0xe7   :  { %3393 = vmatpush2.bf16.msra.mxu0 %v3952_v47  ;;  %v453_v38 = vld [vmem:[#allocation5 + $0xc68] sm:$0xff]  ;;  %v4152_v47 = vcombine.low %v321_v34, %v325_v35 }
  0xe8   :  { %3444 = vmatprep.subr.bf16.mxu0 %v4201_v48  ;;  %v4281_v43 = vcombine.high %v449_v37, %v453_v38  ;;  %v313_v44 = vld [vmem:[#allocation5 + $0x808] sm:$0xff] }
  0xe9   :  { %3434 = vmatpush2.bf16.msra.mxu1 %v4080_v22  ;;  %v317_v45 = vld [vmem:[#allocation5 + $0x828] sm:$0xff]  ;;  %v4280_v22 = vcombine.low %v449_v37, %v453_v38 }
  0xea   :  { %3485 = vmatprep.subr.bf16.mxu1 %v4329_v49  ;;  %3395 = vmatmul.mubr.bf16.vlgmr.msra.gmra.mxu0 %v4550_v16  ;;  %v441_v19 = vld [vmem:[#allocation5 + $0xc08] sm:$0xff]  ;;  %v4145_v48 = vcombine.high %v313_v44, %v317_v45 }
  0xeb   :  { %3445 = vmatpush1.bf16.msra.mxu0 %v4200_v56  ;;  %3476 = vmatprep.mubr.bf16.mxu0 %v4562_v27  ;;  %v445_v46 = vld [vmem:[#allocation5 + $0xc28] sm:$0xff]  ;;  %v4144_v56 = vcombine.low %v313_v44, %v317_v45 }
  0xec   :  { %3436 = vmatmul.mubr.bf16.vlgmr.msra.gmra.mxu1 %v4556_v20  ;;  %3446 = vmatprep.subr.bf16.mxu0 %v4193_v60  ;;  %v4273_v49 = vcombine.high %v441_v19, %v445_v46  ;;  %v433_v50 = vld [vmem:[#allocation5 + $0xbc8] sm:$0xff] }
  0xed   :  { %3486 = vmatpush1.bf16.msra.mxu1 %v4328_v57  ;;  %3517 = vmatprep.mubr.bf16.mxu1 %v4567_v29  ;;  %v437_v51 = vld [vmem:[#allocation5 + $0xbe8] sm:$0xff]  ;;  %v4272_v57 = vcombine.low %v441_v19, %v445_v46 }
  0xee   :  { %3487 = vmatprep.subr.bf16.mxu1 %v4321_v61  ;;  %v561_v52 = vld [vmem:[#allocation5 + $0xfc8] sm:$0xff]  ;;  %v4265_v60 = vcombine.high %v433_v50, %v437_v51 }
  0xef   :  { %3447 = vmatpush1.bf16.msra.mxu0 %v4192_v2  ;;  %v565_v55 = vld [vmem:[#allocation5 + $0xfe8] sm:$0xff]  ;;  %v4264_v2 = vcombine.low %v433_v50, %v437_v51 }
  0xf0   :  { %3448 = vmatprep.subr.bf16.mxu0 %v4185_v4  ;;  %v4393_v61 = vcombine.high %v561_v52, %v565_v55  ;;  %v425_v62 = vld [vmem:[#allocation5 + $0xb88] sm:$0xff] }
  0xf1   :  { %3488 = vmatpush1.bf16.msra.mxu1 %v4320_v3  ;;  %v429_v63 = vld [vmem:[#allocation5 + $0xba8] sm:$0xff]  ;;  %v4392_v3 = vcombine.low %v561_v52, %v565_v55 }
  0xf2   :  { %3489 = vmatprep.subr.bf16.mxu1 %v4313_v5  ;;  %v553_v0 = vld [vmem:[#allocation5 + $0xf88] sm:$0xff]  ;;  %v4257_v4 = vcombine.high %v425_v62, %v429_v63 }
  0xf3   :  { %3449 = vmatpush1.bf16.msra.mxu0 %v4184_v10  ;;  %v557_v1 = vld [vmem:[#allocation5 + $0xfa8] sm:$0xff]  ;;  %v4256_v10 = vcombine.low %v425_v62, %v429_v63  ;;  %v114_v62 = vld [vmem:[#allocation5 + $0x1d0] sm:$0xff] }
  0xf4   :  { %3450 = vmatprep.subr.bf16.mxu0 %v4177_v12  ;;  %v4385_v5 = vcombine.high %v553_v0, %v557_v1  ;;  %v417_v6 = vld [vmem:[#allocation5 + $0xb48] sm:$0xff]  ;;  %v118_v63 = vld [vmem:[#allocation5 + $0x1f0] sm:$0xff] }
  0xf5   :  { %3490 = vmatpush1.bf16.msra.mxu1 %v4312_v11  ;;  %v421_v7 = vld [vmem:[#allocation5 + $0xb68] sm:$0xff]  ;;  %v4384_v11 = vcombine.low %v553_v0, %v557_v1  ;;  %v242_v0 = vld [vmem:[#allocation5 + $0x5d0] sm:$0xff] }
  0xf6   :  { %3491 = vmatprep.subr.bf16.mxu1 %v4305_v13  ;;  %v545_v8 = vld [vmem:[#allocation5 + $0xf48] sm:$0xff]  ;;  %v4249_v12 = vcombine.high %v417_v6, %v421_v7  ;;  %v246_v1 = vld [vmem:[#allocation5 + $0x5f0] sm:$0xff] }
  0xf7   :  { %3451 = vmatpush1.bf16.msra.mxu0 %v4176_v21  ;;  %v549_v9 = vld [vmem:[#allocation5 + $0xf68] sm:$0xff]  ;;  %v4248_v21 = vcombine.low %v417_v6, %v421_v7  ;;  %v106_v6 = vld [vmem:[#allocation5 + $0x190] sm:$0xff] }
  0xf8   :  { %3452 = vmatprep.subr.bf16.mxu0 %v4169_v24  ;;  %v4377_v13 = vcombine.high %v545_v8, %v549_v9  ;;  %v409_v14 = vld [vmem:[#allocation5 + $0xb08] sm:$0xff]  ;;  %v110_v7 = vld [vmem:[#allocation5 + $0x1b0] sm:$0xff] }
  0xf9   :  { %3492 = vmatpush1.bf16.msra.mxu1 %v4304_v23  ;;  %v413_v15 = vld [vmem:[#allocation5 + $0xb28] sm:$0xff]  ;;  %v4376_v23 = vcombine.low %v545_v8, %v549_v9  ;;  %v234_v8 = vld [vmem:[#allocation5 + $0x590] sm:$0xff] }
  0xfa   :  { %3493 = vmatprep.subr.bf16.mxu1 %v4297_v25  ;;  %v537_v17 = vld [vmem:[#allocation5 + $0xf08] sm:$0xff]  ;;  %v4241_v24 = vcombine.high %v409_v14, %v413_v15  ;;  %v238_v9 = vld [vmem:[#allocation5 + $0x5b0] sm:$0xff] }
  0xfb   :  { %3453 = vmatpush1.bf16.msra.mxu0 %v4168_v30  ;;  %v541_v18 = vld [vmem:[#allocation5 + $0xf28] sm:$0xff]  ;;  %v4240_v30 = vcombine.low %v409_v14, %v413_v15  ;;  %v98_v14 = vld [vmem:[#allocation5 + $0x150] sm:$0xff] }
  0xfc   :  { %3454 = vmatprep.subr.bf16.mxu0 %v4161_v32  ;;  %v4369_v25 = vcombine.high %v537_v17, %v541_v18  ;;  %v401_v53 = vld [vmem:[#allocation5 + $0xac8] sm:$0xff]  ;;  %v102_v15 = vld [vmem:[#allocation5 + $0x170] sm:$0xff] }
  0xfd   :  { %3494 = vmatpush1.bf16.msra.mxu1 %v4296_v31  ;;  %v405_v26 = vld [vmem:[#allocation5 + $0xae8] sm:$0xff]  ;;  %v4368_v31 = vcombine.low %v537_v17, %v541_v18  ;;  %v226_v18 = vld [vmem:[#allocation5 + $0x550] sm:$0xff] }
  0xfe   :  { %3495 = vmatprep.subr.bf16.mxu1 %v4289_v33  ;;  %v529_v28 = vld [vmem:[#allocation5 + $0xec8] sm:$0xff]  ;;  %v4233_v32 = vcombine.high %v401_v53, %v405_v26 }
  0xff   :  { %3455 = vmatpush1.bf16.msra.mxu0 %v4160_v40  ;;  %v533_v54 = vld [vmem:[#allocation5 + $0xee8] sm:$0xff]  ;;  %v4232_v40 = vcombine.low %v401_v53, %v405_v26  ;;  %v4066_v53 = vcombine.low %v234_v8, %v238_v9  ;;  %v3931_v26 = vcombine.high %v98_v14, %v102_v15 }
 0x100   :  { %3456 = vmatprep.subr.bf16.mxu0 %v4153_v42  ;;  %v4361_v33 = vcombine.high %v529_v28, %v533_v54  ;;  %v393_v34 = vld [vmem:[#allocation5 + $0xa88] sm:$0xff] }
 0x101   :  { %3496 = vmatpush1.bf16.msra.mxu1 %v4288_v41  ;;  %v397_v35 = vld [vmem:[#allocation5 + $0xaa8] sm:$0xff]  ;;  %v4360_v41 = vcombine.low %v529_v28, %v533_v54 }
 0x102   :  { %3497 = vmatprep.subr.bf16.mxu1 %v4281_v43  ;;  %v521_v37 = vld [vmem:[#allocation5 + $0xe88] sm:$0xff]  ;;  %v4225_v42 = vcombine.high %v393_v34, %v397_v35 }
 0x103   :  { %3457 = vmatpush1.bf16.msra.mxu0 %v4152_v47  ;;  %v525_v38 = vld [vmem:[#allocation5 + $0xea8] sm:$0xff]  ;;  %v4224_v47 = vcombine.low %v393_v34, %v397_v35  ;;  %v222_v34 = vld [vmem:[#allocation5 + $0x530] sm:$0xff] }
 0x104   :  { %3458 = vmatprep.subr.bf16.mxu0 %v4145_v48  ;;  %v4353_v43 = vcombine.high %v521_v37, %v525_v38  ;;  %v385_v44 = vld [vmem:[#allocation5 + $0xa48] sm:$0xff] }
 0x105   :  { %3498 = vmatpush1.bf16.msra.mxu1 %v4280_v22  ;;  %v389_v45 = vld [vmem:[#allocation5 + $0xa68] sm:$0xff]  ;;  %v4352_v22 = vcombine.low %v521_v37, %v525_v38  ;;  %v3930_v37 = vcombine.low %v98_v14, %v102_v15  ;;  %v178_v14 = vld [vmem:[#allocation5 + $0x3d0] sm:$0xff] }
 0x106   :  { %3499 = vmatprep.subr.bf16.mxu1 %v4273_v49  ;;  %v513_v19 = vld [vmem:[#allocation5 + $0xe48] sm:$0xff]  ;;  %v4217_v48 = vcombine.high %v385_v44, %v389_v45  ;;  %v182_v15 = vld [vmem:[#allocation5 + $0x3f0] sm:$0xff] }
 0x107   :  { %3459 = vmatpush1.bf16.msra.mxu0 %v4144_v56  ;;  %v517_v46 = vld [vmem:[#allocation5 + $0xe68] sm:$0xff]  ;;  %v4216_v56 = vcombine.low %v385_v44, %v389_v45  ;;  %v82_v44 = vld [vmem:[#allocation5 + $0xd0] sm:$0xff] }
 0x108   :  { %3460 = vmatprep.subr.bf16.mxu0 %v4265_v60  ;;  %v4345_v49 = vcombine.high %v513_v19, %v517_v46  ;;  %v377_v50 = vld [vmem:[#allocation5 + $0xa08] sm:$0xff]  ;;  %v86_v45 = vld [vmem:[#allocation5 + $0xf0] sm:$0xff] }
 0x109   :  { %3500 = vmatpush1.bf16.msra.mxu1 %v4272_v57  ;;  %v381_v51 = vld [vmem:[#allocation5 + $0xa28] sm:$0xff]  ;;  %v4344_v57 = vcombine.low %v513_v19, %v517_v46  ;;  %v210_v19 = vld [vmem:[#allocation5 + $0x4d0] sm:$0xff] }
 0x10a   :  { %3501 = vmatprep.subr.bf16.mxu1 %v4393_v61  ;;  %v505_v52 = vld [vmem:[#allocation5 + $0xe08] sm:$0xff]  ;;  %v4209_v60 = vcombine.high %v377_v50, %v381_v51  ;;  %v214_v46 = vld [vmem:[#allocation5 + $0x4f0] sm:$0xff] }
 0x10b   :  { %3461 = vmatpush2.bf16.msra.mxu0 %v4264_v2  ;;  %v509_v55 = vld [vmem:[#allocation5 + $0xe28] sm:$0xff]  ;;  %v4208_v2 = vcombine.low %v377_v50, %v381_v51  ;;  %v74_v50 = vld [vmem:[#allocation5 + $0x90] sm:$0xff] }
 0x10c   :  { %3462 = vmatprep.subr.bf16.mxu0 %v4257_v4  ;;  %v4337_v61 = vcombine.high %v505_v52, %v509_v55  ;;  %v3947_v4 = vcombine.high %v114_v62, %v118_v63  ;;  %v78_v51 = vld [vmem:[#allocation5 + $0xb0] sm:$0xff] }
 0x10d   :  { %3502 = vmatpush2.bf16.msra.mxu1 %v4392_v3  ;;  %v4336_v3 = vcombine.low %v505_v52, %v509_v55  ;;  %v202_v52 = vld [vmem:[#allocation5 + $0x490] sm:$0xff] }
 0x10e   :  { %3503 = vmatprep.subr.bf16.mxu1 %v4385_v5  ;;  %v4075_v5 = vcombine.high %v242_v0, %v246_v1  ;;  %v206_v55 = vld [vmem:[#allocation5 + $0x4b0] sm:$0xff] }
 0x10f   :  { %3463 = vmatpush2.bf16.msra.mxu0 %v4256_v10  ;;  %v3946_v10 = vcombine.low %v114_v62, %v118_v63  ;;  %v66_v62 = vld [vmem:[#allocation5 + $0x50] sm:$0xff] }
 0x110   :  { %3464 = vmatprep.subr.bf16.mxu0 %v4249_v12  ;;  %v3939_v12 = vcombine.high %v106_v6, %v110_v7  ;;  %v70_v63 = vld [vmem:[#allocation5 + $0x70] sm:$0xff] }
 0x111   :  { %3504 = vmatpush2.bf16.msra.mxu1 %v4384_v11  ;;  %v4074_v11 = vcombine.low %v242_v0, %v246_v1  ;;  %v194_v0 = vld [vmem:[#allocation5 + $0x450] sm:$0xff] }
 0x112   :  { %3505 = vmatprep.subr.bf16.mxu1 %v4377_v13  ;;  %v4067_v13 = vcombine.high %v234_v8, %v238_v9  ;;  %v198_v1 = vld [vmem:[#allocation5 + $0x470] sm:$0xff] }
 0x113   :  { %3465 = vmatpush2.bf16.msra.mxu0 %v4248_v21  ;;  %v230_v21 = vld [vmem:[#allocation5 + $0x570] sm:$0xff] }
 0x114   :  { %3466 = vmatprep.subr.bf16.mxu0 %v4241_v24  ;;  %v3938_v24 = vcombine.low %v106_v6, %v110_v7  ;;  %v4059_v54 = vcombine.high %v226_v18, %v230_v21  ;;  %v58_v6 = vld [vmem:[#allocation5 + $0x10] sm:$0xff] }
 0x115   :  { %3506 = vmatpush2.bf16.msra.mxu1 %v4376_v23  ;;  %v62_v7 = vld [vmem:[#allocation5 + $0x30] sm:$0xff] }
 0x116   :  { %3507 = vmatprep.subr.bf16.mxu1 %v4369_v25  ;;  %v186_v8 = vld [vmem:[#allocation5 + $0x410] sm:$0xff] }
 0x117   :  { %3467 = vmatpush2.bf16.msra.mxu0 %v4240_v30  ;;  %v90_v30 = vld [vmem:[#allocation5 + $0x110] sm:$0xff] }
 0x118   :  { %3468 = vmatprep.subr.bf16.mxu0 %v4233_v32  ;;  %v190_v9 = vld [vmem:[#allocation5 + $0x430] sm:$0xff] }
 0x119   :  { %3508 = vmatpush2.bf16.msra.mxu1 %v4368_v31  ;;  %v94_v31 = vld [vmem:[#allocation5 + $0x130] sm:$0xff] }
 0x11a   :  { %3509 = vmatprep.subr.bf16.mxu1 %v4361_v33  ;;  %v218_v33 = vld [vmem:[#allocation5 + $0x510] sm:$0xff] }
 0x11b   :  { %3469 = vmatpush2.bf16.msra.mxu0 %v4232_v40  ;;  %v4058_v40 = vcombine.low %v226_v18, %v230_v21  ;;  %v306_v18 = vld [vmem:[#allocation5 + $0x7d0] sm:$0xff] }
 0x11c   :  { %3470 = vmatprep.subr.bf16.mxu0 %v4225_v42  ;;  %v310_v21 = vld [vmem:[#allocation5 + $0x7f0] sm:$0xff] }
 0x11d   :  { %3510 = vmatpush2.bf16.msra.mxu1 %v4360_v41  ;;  %v3923_v41 = vcombine.high %v90_v30, %v94_v31 }
 0x11e   :  { %3511 = vmatprep.subr.bf16.mxu1 %v4353_v43  ;;  %v4051_v43 = vcombine.high %v218_v33, %v222_v34 }
 0x11f   :  { %3471 = vmatpush2.bf16.msra.mxu0 %v4224_v47  ;;  %v3922_v47 = vcombine.low %v90_v30, %v94_v31  ;;  %v170_v30 = vld [vmem:[#allocation5 + $0x390] sm:$0xff] }
 0x120   :  { %3472 = vmatprep.subr.bf16.mxu0 %v4217_v48  ;;  %v3915_v48 = vcombine.high %v82_v44, %v86_v45  ;;  %v174_v31 = vld [vmem:[#allocation5 + $0x3b0] sm:$0xff] }
 0x121   :  { %3512 = vmatpush2.bf16.msra.mxu1 %v4352_v22  ;;  %v4050_v22 = vcombine.low %v218_v33, %v222_v34  ;;  %v302_v33 = vld [vmem:[#allocation5 + $0x7b0] sm:$0xff]  ;;  %v4010_v34 = vcombine.low %v178_v14, %v182_v15 }
 0x122   :  { %3513 = vmatprep.subr.bf16.mxu1 %v4345_v49  ;;  %v4043_v49 = vcombine.high %v210_v19, %v214_v46 }
 0x123   :  { %3473 = vmatpush2.bf16.msra.mxu0 %v4216_v56  ;;  %v3914_v56 = vcombine.low %v82_v44, %v86_v45  ;;  %v4002_v44 = vcombine.low %v170_v30, %v174_v31 }
 0x124   :  { %3474 = vmatprep.subr.bf16.mxu0 %v4209_v60  ;;  %v3907_v60 = vcombine.high %v74_v50, %v78_v51 }
 0x125   :  { %3514 = vmatpush2.bf16.msra.mxu1 %v4344_v57  ;;  %v4042_v57 = vcombine.low %v210_v19, %v214_v46 }
 0x126   :  { %3515 = vmatprep.subr.bf16.mxu1 %v4337_v61  ;;  %v4035_v61 = vcombine.high %v202_v52, %v206_v55 }
 0x127   :  { %3475 = vmatpush2.bf16.msra.mxu0 %v4208_v2  ;;  %v3906_v2 = vcombine.low %v74_v50, %v78_v51 }
 0x128   :  { %3526 = vmatprep.subr.bf16.mxu0 %v3947_v4  ;;  %v3899_v4 = vcombine.high %v66_v62, %v70_v63 }
 0x129   :  { %3516 = vmatpush2.bf16.msra.mxu1 %v4336_v3  ;;  %v4034_v3 = vcombine.low %v202_v52, %v206_v55 }
 0x12a   :  { %3567 = vmatprep.subr.bf16.mxu1 %v4075_v5  ;;  %v4588_v17 = vpop.f32.mrf.mxu0  ;;  %3477 = vmatmul.mubr.bf16.vlgmr.msra.gmra.mxu0 %v4574_v36  ;;  %v4027_v5 = vcombine.high %v194_v0, %v198_v1 }
 0x12b   :  { %3527 = vmatpush1.bf16.msra.mxu0 %v3946_v10  ;;  %3558 = vmatprep.mubr.bf16.mxu0 %v4540_v58  ;;  %v3898_v10 = vcombine.low %v66_v62, %v70_v63 }
 0x12c   :  { %v4591_v23 = vpop.f32.mrf.mxu1  ;;  %3518 = vmatmul.mubr.bf16.vlgmr.msra.gmra.mxu1 %v4578_v39  ;;  %v4594_v25 = vpop.f32.mrf.mxu0  ;;  %3528 = vmatprep.subr.bf16.mxu0 %v3939_v12  ;;  %v3891_v12 = vcombine.high %v58_v6, %v62_v7 }
 0x12d   :  { %3568 = vmatpush1.bf16.msra.mxu1 %v4074_v11  ;;  %3599 = vmatprep.mubr.bf16.mxu1 %v4544_v59  ;;  %v4026_v11 = vcombine.low %v194_v0, %v198_v1  ;;  %v570_v1 = vlaneseq }
 0x12e   :  { %v4596_v28 = vpop.f32.mrf.mxu1  ;;  %3569 = vmatprep.subr.bf16.mxu1 %v4067_v13  ;;  %v3236_v32 = vpop.f32.mrf.mxu0  ;;  %v4019_v13 = vcombine.high %v186_v8, %v190_v9 }
 0x12f   :  { %3529 = vmatpush1.bf16.msra.mxu0 %v3938_v24  ;;  %v3890_v24 = vcombine.low %v58_v6, %v62_v7  ;;  %v298_v32 = vld [vmem:[#allocation5 + $0x790] sm:$0xff] }
 0x130   :  { %v3277_v35 = vpop.f32.mrf.mxu1  ;;  %v3237_v38 = vpop.f32.mrf.mxu0  ;;  %3530 = vmatprep.subr.bf16.mxu0 %v3931_v26  ;;  %v4011_v26 = vcombine.high %v178_v14, %v182_v15  ;;  %v4130_v45 = vcombine.low %v298_v32, %v302_v33  ;;  %v270_v6 = vld [vmem:[#allocation5 + $0x6b0] sm:$0xff] }
 0x131   :  { %3570 = vmatpush1.bf16.msra.mxu1 %v4066_v53  ;;  %v4018_v53 = vcombine.low %v186_v8, %v190_v9  ;;  %v4138_v35 = vcombine.low %v306_v18, %v310_v21  ;;  %v4131_v38 = vcombine.high %v298_v32, %v302_v33  ;;  %v258_v14 = vld [vmem:[#allocation5 + $0x650] sm:$0xff] }
 0x132   :  { %v3278_v42 = vpop.f32.mrf.mxu1  ;;  %3571 = vmatprep.subr.bf16.mxu1 %v4059_v54  ;;  %v4139_v54 = vcombine.high %v306_v18, %v310_v21  ;;  %v262_v15 = vld [vmem:[#allocation5 + $0x670] sm:$0xff] }
 0x133   :  { %3531 = vmatpush1.bf16.msra.mxu0 %v3930_v37  ;;  %v4003_v37 = vcombine.high %v170_v30, %v174_v31  ;;  %v290_v42 = vld [vmem:[#allocation5 + $0x750] sm:$0xff]  ;;  %v4603_v31 = vld [vmem:[#allocation7] sm:$0xff] }
 0x134   :  { %3532 = vmatprep.subr.bf16.mxu0 %v3923_v41  ;;  %v166_v41 = vld [vmem:[#allocation5 + $0x370] sm:$0xff] }
 0x135   :  { %3572 = vmatpush1.bf16.msra.mxu1 %v4058_v40  ;;  %v162_v40 = vld [vmem:[#allocation5 + $0x350] sm:$0xff] }
 0x136   :  { %3573 = vmatprep.subr.bf16.mxu1 %v4051_v43  ;;  %v294_v43 = vld [vmem:[#allocation5 + $0x770] sm:$0xff]  ;;  %v3995_v19 = vcombine.high %v162_v40, %v166_v41  ;;  %v3994_v50 = vcombine.low %v162_v40, %v166_v41 }
 0x137   :  { %3533 = vmatpush1.bf16.msra.mxu0 %v3922_v47  ;;  %v4123_v46 = vcombine.high %v290_v42, %v294_v43  ;;  %v154_v47 = vld [vmem:[#allocation5 + $0x310] sm:$0xff]  ;;  %v4122_v51 = vcombine.low %v290_v42, %v294_v43 }
 0x138   :  { %3534 = vmatprep.subr.bf16.mxu0 %v3915_v48  ;;  %v282_v48 = vld [vmem:[#allocation5 + $0x710] sm:$0xff] }
 0x139   :  { %3574 = vmatpush1.bf16.msra.mxu1 %v4050_v22  ;;  %v158_v22 = vld [vmem:[#allocation5 + $0x330] sm:$0xff] }
 0x13a   :  { %3575 = vmatprep.subr.bf16.mxu1 %v4043_v49  ;;  %v286_v49 = vld [vmem:[#allocation5 + $0x730] sm:$0xff]  ;;  %v3987_v52 = vcombine.high %v154_v47, %v158_v22  ;;  %v3986_v62 = vcombine.low %v154_v47, %v158_v22 }
 0x13b   :  { %3535 = vmatpush1.bf16.msra.mxu0 %v3914_v56  ;;  %v4115_v55 = vcombine.high %v282_v48, %v286_v49  ;;  %v146_v56 = vld [vmem:[#allocation5 + $0x2d0] sm:$0xff]  ;;  %v4114_v63 = vcombine.low %v282_v48, %v286_v49 }
 0x13c   :  { %3536 = vmatprep.subr.bf16.mxu0 %v3907_v60  ;;  %v274_v60 = vld [vmem:[#allocation5 + $0x6d0] sm:$0xff] }
 0x13d   :  { %3576 = vmatpush1.bf16.msra.mxu1 %v4042_v57  ;;  %v150_v57 = vld [vmem:[#allocation5 + $0x2f0] sm:$0xff] }
 0x13e   :  { %3577 = vmatprep.subr.bf16.mxu1 %v4035_v61  ;;  %v278_v61 = vld [vmem:[#allocation5 + $0x6f0] sm:$0xff]  ;;  %v3979_v0 = vcombine.high %v146_v56, %v150_v57  ;;  %v3978_v7 = vcombine.low %v146_v56, %v150_v57 }
 0x13f   :  { %3537 = vmatpush1.bf16.msra.mxu0 %v3906_v2  ;;  %v4107_v2 = vcombine.high %v274_v60, %v278_v61  ;;  %v4106_v8 = vcombine.low %v274_v60, %v278_v61  ;;  %v126_v30 = vld [vmem:[#allocation5 + $0x230] sm:$0xff] }
 0x140   :  { %3538 = vmatprep.subr.bf16.mxu0 %v3899_v4  ;;  %v142_v4 = vld [vmem:[#allocation5 + $0x2b0] sm:$0xff] }
 0x141   :  { %3578 = vmatpush1.bf16.msra.mxu1 %v4034_v3  ;;  %v138_v3 = vld [vmem:[#allocation5 + $0x290] sm:$0xff] }
 0x142   :  { %3579 = vmatprep.subr.bf16.mxu1 %v4027_v5  ;;  %v266_v5 = vld [vmem:[#allocation5 + $0x690] sm:$0xff]  ;;  %v3971_v9 = vcombine.high %v138_v3, %v142_v4  ;;  %v3970_v18 = vcombine.low %v138_v3, %v142_v4 }
 0x143   :  { %3539 = vmatpush1.bf16.msra.mxu0 %v3898_v10  ;;  %v4600_v10 = vshrl.u32 %v570_v1, 7  ;;  %v4098_v21 = vcombine.low %v266_v5, %v270_v6  ;;  %v250_v32 = vld [vmem:[#allocation5 + $0x610] sm:$0xff] }
 0x144   :  { %3540 = vmatprep.subr.bf16.mxu0 %v3891_v12  ;;  %v130_v12 = vld [vmem:[#allocation5 + $0x250] sm:$0xff] }
 0x145   :  { %3580 = vmatpush1.bf16.msra.mxu1 %v4026_v11  ;;  %v4099_v11 = vcombine.high %v266_v5, %v270_v6  ;;  %v254_v33 = vld [vmem:[#allocation5 + $0x630] sm:$0xff] }
 0x146   :  { %3581 = vmatprep.subr.bf16.mxu1 %v4019_v13  ;;  %v134_v13 = vld [vmem:[#allocation5 + $0x270] sm:$0xff]  ;;  %v4083_v41 = vcombine.high %v250_v32, %v254_v33  ;;  %v4082_v47 = vcombine.low %v250_v32, %v254_v33 }
 0x147   :  { %3541 = vmatpush1.bf16.msra.mxu0 %v3890_v24  ;;  %v3963_v24 = vcombine.high %v130_v12, %v134_v13  ;;  %v370_v42 = vld [vmem:[#allocation5 + $0x9d0] sm:$0xff] }
 0x148   :  { %3542 = vmatprep.subr.bf16.mxu0 %v4011_v26  ;;  %v4091_v26 = vcombine.high %v258_v14, %v262_v15  ;;  %v374_v43 = vld [vmem:[#allocation5 + $0x9f0] sm:$0xff] }
 0x149   :  { %3582 = vmatpush1.bf16.msra.mxu1 %v4018_v53  ;;  %v572_v53 = vsub.s32 0, %v4600_v10  ;;  %v4203_v22 = vcombine.high %v370_v42, %v374_v43  ;;  %v4202_v57 = vcombine.low %v370_v42, %v374_v43  ;;  %v486_v3 = vld [vmem:[#allocation5 + $0xd70] sm:$0xff] }
 0x14a   :  { %3583 = vmatprep.subr.bf16.mxu1 %v4139_v54  ;;  %v122_v54 = vld [vmem:[#allocation5 + $0x210] sm:$0xff] }
 0x14b   :  { %3543 = vmatpush2.bf16.msra.mxu0 %v4010_v34  ;;  %v576_v34 = vsub.s32 1, %v4600_v10  ;;  %v573_v40 = vrot.slane %v4603_v31, %v572_v53 }
 0x14c   :  { %3544 = vmatprep.subr.bf16.mxu0 %v4003_v37  ;;  %v4090_v37 = vcombine.low %v258_v14, %v262_v15  ;;  %v346_v14 = vld [vmem:[#allocation5 + $0x910] sm:$0xff] }
 0x14d   :  { %3584 = vmatpush2.bf16.msra.mxu1 %v4138_v35  ;;  %v3962_v35 = vcombine.low %v130_v12, %v134_v13  ;;  %v3233_v48 = vadd.f32 %v4588_v17, %v573_v40  ;;  %v358_v17 = vld [vmem:[#allocation5 + $0x970] sm:$0xff] }
 0x14e   :  { %3585 = vmatprep.subr.bf16.mxu1 %v4131_v38  ;;  %v3955_v38 = vcombine.high %v122_v54, %v126_v30  ;;  %v350_v15 = vld [vmem:[#allocation5 + $0x930] sm:$0xff] }
 0x14f   :  { %3545 = vmatpush2.bf16.msra.mxu0 %v4002_v44  ;;  %v498_v44 = vld [vmem:[#allocation5 + $0xdd0] sm:$0xff]  ;;  %v4179_v32 = vcombine.high %v346_v14, %v350_v15 }
 0x150   :  { %3546 = vmatprep.subr.bf16.mxu0 %v3995_v19  ;;  %v577_v19 = vrot.slane %v4603_v31, %v576_v34  ;;  %v470_v40 = vld [vmem:[#allocation5 + $0xcf0] sm:$0xff] }
 0x151   :  { %3586 = vmatpush2.bf16.msra.mxu1 %v4130_v45  ;;  %v502_v45 = vld [vmem:[#allocation5 + $0xdf0] sm:$0xff] }
 0x152   :  { %3587 = vmatprep.subr.bf16.mxu1 %v4123_v46  ;;  %v3954_v46 = vcombine.low %v122_v54, %v126_v30  ;;  %v4331_v49 = vcombine.high %v498_v44, %v502_v45  ;;  %v3235_v56 = vadd.f32 %v4594_v25, %v577_v19  ;;  %v4330_v60 = vcombine.low %v498_v44, %v502_v45  ;;  %v330_v45 = vld [vmem:[#allocation5 + $0x890] sm:$0xff] }
 0x153   :  { %3547 = vmatpush2.bf16.msra.mxu0 %v3994_v50  ;;  %v362_v50 = vld [vmem:[#allocation5 + $0x990] sm:$0xff] }
 0x154   :  { %3548 = vmatprep.subr.bf16.mxu0 %v3987_v52  ;;  %v490_v52 = vld [vmem:[#allocation5 + $0xd90] sm:$0xff]  ;;  %v3276_v4 = vadd.f32 %v4596_v28, %v3235_v56 }
 0x155   :  { %3588 = vmatpush2.bf16.msra.mxu1 %v4122_v51  ;;  %v366_v51 = vld [vmem:[#allocation5 + $0x9b0] sm:$0xff] }
 0x156   :  { %3589 = vmatprep.subr.bf16.mxu1 %v4115_v55  ;;  %v494_v55 = vld [vmem:[#allocation5 + $0xdb0] sm:$0xff]  ;;  %v4195_v61 = vcombine.high %v362_v50, %v366_v51  ;;  %v4194_v6 = vcombine.low %v362_v50, %v366_v51 }
 0x157   :  { %3549 = vmatpush2.bf16.msra.mxu0 %v3986_v62  ;;  %v3274_v62 = vadd.f32 %v4591_v23, %v3233_v48  ;;  %v4322_v23 = vcombine.low %v490_v52, %v494_v55  ;;  %v334_v19 = vld [vmem:[#allocation5 + $0x8b0] sm:$0xff] }
 0x158   :  { %3550 = vmatprep.subr.bf16.mxu0 %v3979_v0  ;;  %v354_v0 = vld [vmem:[#allocation5 + $0x950] sm:$0xff] }
 0x159   :  { %3590 = vmatpush2.bf16.msra.mxu1 %v4114_v63  ;;  %v4323_v63 = vcombine.high %v490_v52, %v494_v55  ;;  %v322_v51 = vld [vmem:[#allocation5 + $0x850] sm:$0xff] }
 0x15a   :  { %3591 = vmatprep.subr.bf16.mxu1 %v4107_v2  ;;  %v482_v2 = vld [vmem:[#allocation5 + $0xd50] sm:$0xff] }
 0x15b   :  { %3551 = vmatpush2.bf16.msra.mxu0 %v3978_v7  ;;  %v4315_v13 = vcombine.high %v482_v2, %v486_v3  ;;  %v4314_v30 = vcombine.low %v482_v2, %v486_v3  ;;  %v326_v52 = vld [vmem:[#allocation5 + $0x870] sm:$0xff] }
 0x15c   :  { %3552 = vmatprep.subr.bf16.mxu0 %v3971_v9  ;;  %v450_v55 = vld [vmem:[#allocation5 + $0xc50] sm:$0xff]  ;;  %v4154_v2 = vcombine.low %v322_v51, %v326_v52 }
 0x15d   :  { %3592 = vmatpush2.bf16.msra.mxu1 %v4106_v8  ;;  %v4187_v8 = vcombine.high %v354_v0, %v358_v17  ;;  %v454_v56 = vld [vmem:[#allocation5 + $0xc70] sm:$0xff] }
 0x15e   :  { %3593 = vmatprep.subr.bf16.mxu1 %v4099_v11  ;;  %v4282_v3 = vcombine.low %v450_v55, %v454_v56 }
 0x15f   :  { %3553 = vmatpush2.bf16.msra.mxu0 %v3970_v18  ;;  %v474_v18 = vld [vmem:[#allocation5 + $0xd10] sm:$0xff] }
 0x160   :  { %3554 = vmatprep.subr.bf16.mxu0 %v3963_v24 }
 0x161   :  { %3594 = vmatpush2.bf16.msra.mxu1 %v4098_v21  ;;  %v478_v21 = vld [vmem:[#allocation5 + $0xd30] sm:$0xff] }
 0x162   :  { %3595 = vmatprep.subr.bf16.mxu1 %v4091_v26  ;;  %v4186_v26 = vcombine.low %v354_v0, %v358_v17  ;;  %v4307_v34 = vcombine.high %v474_v18, %v478_v21  ;;  %v4306_v42 = vcombine.low %v474_v18, %v478_v21  ;;  %v318_v0 = vld [vmem:[#allocation5 + $0x830] sm:$0xff] }
 0x163   :  { %3555 = vmatpush2.bf16.msra.mxu0 %v3962_v35  ;;  %v338_v35 = vld [vmem:[#allocation5 + $0x8d0] sm:$0xff] }
 0x164   :  { %3556 = vmatprep.subr.bf16.mxu0 %v3955_v38  ;;  %v466_v38 = vld [vmem:[#allocation5 + $0xcd0] sm:$0xff] }
 0x165   :  { %3596 = vmatpush2.bf16.msra.mxu1 %v4090_v37  ;;  %v342_v37 = vld [vmem:[#allocation5 + $0x8f0] sm:$0xff]  ;;  %v4299_v44 = vcombine.high %v466_v38, %v470_v40  ;;  %v4298_v48 = vcombine.low %v466_v38, %v470_v40 }
 0x166   :  { %3597 = vmatprep.subr.bf16.mxu1 %v4083_v41  ;;  %v4178_v41 = vcombine.low %v346_v14, %v350_v15  ;;  %v4171_v43 = vcombine.high %v338_v35, %v342_v37  ;;  %v442_v17 = vld [vmem:[#allocation5 + $0xc10] sm:$0xff] }
 0x167   :  { %3557 = vmatpush2.bf16.msra.mxu0 %v3954_v46  ;;  %v458_v46 = vld [vmem:[#allocation5 + $0xc90] sm:$0xff] }
 0x168   :  { %3608 = vmatprep.subr.bf16.mxu0 %v4203_v22  ;;  %v4170_v22 = vcombine.low %v338_v35, %v342_v37  ;;  %v430_v14 = vld [vmem:[#allocation5 + $0xbb0] sm:$0xff] }
 0x169   :  { %3598 = vmatpush2.bf16.msra.mxu1 %v4082_v47  ;;  %v462_v47 = vld [vmem:[#allocation5 + $0xcb0] sm:$0xff] }
 0x16a   :  { %3649 = vmatprep.subr.bf16.mxu1 %v4331_v49  ;;  %v3314_v1 = vpop.f32.mrf.mxu0  ;;  %3559 = vmatmul.mubr.bf16.vlgmr.msra.gmra.mxu0 %v4550_v16  ;;  %v4163_v49 = vcombine.high %v330_v45, %v334_v19  ;;  %v4291_v50 = vcombine.high %v458_v46, %v462_v47  ;;  %v554_v15 = vld [vmem:[#allocation5 + $0xf90] sm:$0xff] }
 0x16b   :  { %v3315_v25 = vadd.f32 %v3314_v1, %v3274_v62  ;;  %3609 = vmatpush1.bf16.msra.mxu0 %v4202_v57  ;;  %3640 = vmatprep.mubr.bf16.mxu0 %v4562_v27  ;;  %v4162_v57 = vcombine.low %v330_v45, %v334_v19  ;;  %v4283_v62 = vcombine.high %v450_v55, %v454_v56  ;;  %v446_v1 = vld [vmem:[#allocation5 + $0xc30] sm:$0xff] }
 0x16c   :  { %v3355_v5 = vpop.f32.mrf.mxu1  ;;  %3600 = vmatmul.mubr.bf16.vlgmr.msra.gmra.mxu1 %v4556_v20  ;;  %v3316_v7 = vpop.f32.mrf.mxu0  ;;  %3610 = vmatprep.subr.bf16.mxu0 %v4195_v61  ;;  %v4155_v61 = vcombine.high %v322_v51, %v326_v52  ;;  %v410_v38 = vld [vmem:[#allocation5 + $0xb10] sm:$0xff] }
 0x16d   :  { %3650 = vmatpush1.bf16.msra.mxu1 %v4330_v60  ;;  %v3356_v9 = vadd.f32 %v3355_v5, %v3315_v25  ;;  %v3317_v11 = vadd.f32 %v3316_v7, %v3276_v4  ;;  %3681 = vmatprep.mubr.bf16.mxu1 %v4567_v29  ;;  %v4290_v60 = vcombine.low %v458_v46, %v462_v47  ;;  %v434_v5 = vld [vmem:[#allocation5 + $0xbd0] sm:$0xff] }
 0x16e   :  { %v3357_v12 = vpop.f32.mrf.mxu1  ;;  %3651 = vmatprep.subr.bf16.mxu1 %v4323_v63  ;;  %v3318_v28 = vpop.f32.mrf.mxu0  ;;  %v314_v63 = vld [vmem:[#allocation5 + $0x810] sm:$0xff]  ;;  %v4275_v25 = vcombine.high %v442_v17, %v446_v1 }
 0x16f   :  { %3854 = vst [vmem:[#allocation8] sm:$0xff] %v3356_v9  ;;  %v3358_v24 = vadd.f32 %v3357_v12, %v3317_v11  ;;  %3611 = vmatpush1.bf16.msra.mxu0 %v4194_v6  ;;  %v4147_v4 = vcombine.high %v314_v63, %v318_v0  ;;  %v438_v6 = vld [vmem:[#allocation5 + $0xbf0] sm:$0xff]  ;;  %v4274_v9 = vcombine.low %v442_v17, %v446_v1 }
 0x170   :  { %v3359_v53 = vpop.f32.mrf.mxu1  ;;  %v3319_v54 = vpop.f32.mrf.mxu0  ;;  %3612 = vmatprep.subr.bf16.mxu0 %v4187_v8  ;;  %v562_v7 = vld [vmem:[#allocation5 + $0xfd0] sm:$0xff]  ;;  %v4146_v8 = vcombine.low %v314_v63, %v318_v0  ;;  %v4267_v11 = vcombine.high %v434_v5, %v438_v6  ;;  %v4266_v18 = vcombine.low %v434_v5, %v438_v6 }
 0x171   :  { %3652 = vmatpush1.bf16.msra.mxu1 %v4322_v23  ;;  %3855 = vst [vmem:[#allocation8 + $0x8] sm:$0xff] %v3358_v24  ;;  %v566_v23 = vld [vmem:[#allocation5 + $0xff0] sm:$0xff] }
 0x172   :  { %v3360_v33 = vpop.f32.mrf.mxu1  ;;  %3653 = vmatprep.subr.bf16.mxu1 %v4315_v13  ;;  %v4395_v12 = vcombine.high %v562_v7, %v566_v23  ;;  %v426_v13 = vld [vmem:[#allocation5 + $0xb90] sm:$0xff]  ;;  %v4394_v21 = vcombine.low %v562_v7, %v566_v23 }
 0x173   :  { %3613 = vmatpush1.bf16.msra.mxu0 %v4186_v26  ;;  %v558_v28 = vld [vmem:[#allocation5 + $0xfb0] sm:$0xff]  ;;  %v4259_v24 = vcombine.high %v426_v13, %v430_v14  ;;  %v4258_v33 = vcombine.low %v426_v13, %v430_v14 }
 0x174   :  { %3614 = vmatprep.subr.bf16.mxu0 %v4179_v32  ;;  %v4387_v53 = vcombine.high %v554_v15, %v558_v28  ;;  %v418_v26 = vld [vmem:[#allocation5 + $0xb50] sm:$0xff] }
 0x175   :  { %3654 = vmatpush1.bf16.msra.mxu1 %v4314_v30  ;;  %v422_v54 = vld [vmem:[#allocation5 + $0xb70] sm:$0xff] }
 0x176   :  { %3655 = vmatprep.subr.bf16.mxu1 %v4307_v34  ;;  %v546_v30 = vld [vmem:[#allocation5 + $0xf50] sm:$0xff]  ;;  %v4386_v34 = vcombine.low %v554_v15, %v558_v28  ;;  %v4251_v35 = vcombine.high %v418_v26, %v422_v54  ;;  %v115_v15 = vld [vmem:[#allocation5 + $0x1d8] sm:$0xff] }
 0x177   :  { %3615 = vmatpush1.bf16.msra.mxu0 %v4178_v41  ;;  %v550_v32 = vld [vmem:[#allocation5 + $0xf70] sm:$0xff]  ;;  %v119_v28 = vld [vmem:[#allocation5 + $0x1f8] sm:$0xff] }
 0x178   :  { %3616 = vmatprep.subr.bf16.mxu0 %v4171_v43  ;;  %v4379_v37 = vcombine.high %v546_v30, %v550_v32  ;;  %v414_v40 = vld [vmem:[#allocation5 + $0xb30] sm:$0xff]  ;;  %v4250_v43 = vcombine.low %v418_v26, %v422_v54  ;;  %v3949_v26 = vcombine.high %v115_v15, %v119_v28 }
 0x179   :  { %3656 = vmatpush1.bf16.msra.mxu1 %v4306_v42  ;;  %v538_v41 = vld [vmem:[#allocation5 + $0xf10] sm:$0xff]  ;;  %v4243_v45 = vcombine.high %v410_v38, %v414_v40 }
 0x17a   :  { %3657 = vmatprep.subr.bf16.mxu1 %v4299_v44  ;;  %v542_v42 = vld [vmem:[#allocation5 + $0xf30] sm:$0xff]  ;;  %v4378_v44 = vcombine.low %v546_v30, %v550_v32  ;;  %v107_v30 = vld [vmem:[#allocation5 + $0x198] sm:$0xff] }
 0x17b   :  { %3617 = vmatpush1.bf16.msra.mxu0 %v4170_v22  ;;  %v4371_v19 = vcombine.high %v538_v41, %v542_v42  ;;  %v402_v46 = vld [vmem:[#allocation5 + $0xad0] sm:$0xff]  ;;  %v111_v32 = vld [vmem:[#allocation5 + $0x1b8] sm:$0xff] }
 0x17c   :  { %3618 = vmatprep.subr.bf16.mxu0 %v4163_v49  ;;  %v406_v47 = vld [vmem:[#allocation5 + $0xaf0] sm:$0xff]  ;;  %v4242_v49 = vcombine.low %v410_v38, %v414_v40  ;;  %v3941_v38 = vcombine.high %v107_v30, %v111_v32 }
 0x17d   :  { %3658 = vmatpush1.bf16.msra.mxu1 %v4298_v48  ;;  %v530_v22 = vld [vmem:[#allocation5 + $0xed0] sm:$0xff]  ;;  %v4235_v51 = vcombine.high %v402_v46, %v406_v47 }
 0x17e   :  { %3659 = vmatprep.subr.bf16.mxu1 %v4291_v50  ;;  %v534_v48 = vld [vmem:[#allocation5 + $0xef0] sm:$0xff]  ;;  %v4370_v50 = vcombine.low %v538_v41, %v542_v42  ;;  %v99_v41 = vld [vmem:[#allocation5 + $0x158] sm:$0xff] }
 0x17f   :  { %3619 = vmatpush1.bf16.msra.mxu0 %v4162_v57  ;;  %v4363_v52 = vcombine.high %v530_v22, %v534_v48  ;;  %v394_v55 = vld [vmem:[#allocation5 + $0xa90] sm:$0xff]  ;;  %v103_v42 = vld [vmem:[#allocation5 + $0x178] sm:$0xff] }
 0x180   :  { %3620 = vmatprep.subr.bf16.mxu0 %v4155_v61  ;;  %v398_v56 = vld [vmem:[#allocation5 + $0xab0] sm:$0xff]  ;;  %v4234_v61 = vcombine.low %v402_v46, %v406_v47  ;;  %v3940_v46 = vcombine.low %v107_v30, %v111_v32  ;;  %v59_v30 = vld [vmem:[#allocation5 + $0x18] sm:$0xff] }
 0x181   :  { %3660 = vmatpush1.bf16.msra.mxu1 %v4290_v60  ;;  %v522_v57 = vld [vmem:[#allocation5 + $0xe90] sm:$0xff]  ;;  %v4227_v63 = vcombine.high %v394_v55, %v398_v56  ;;  %v63_v32 = vld [vmem:[#allocation5 + $0x38] sm:$0xff] }
 0x182   :  { %3661 = vmatprep.subr.bf16.mxu1 %v4283_v62  ;;  %v526_v60 = vld [vmem:[#allocation5 + $0xeb0] sm:$0xff]  ;;  %v4362_v62 = vcombine.low %v530_v22, %v534_v48  ;;  %v3933_v48 = vcombine.high %v99_v41, %v103_v42 }
 0x183   :  { %3621 = vmatpush1.bf16.msra.mxu0 %v4154_v2  ;;  %v4355_v0 = vcombine.high %v522_v57, %v526_v60  ;;  %v386_v17 = vld [vmem:[#allocation5 + $0xa50] sm:$0xff] }
 0x184   :  { %3622 = vmatprep.subr.bf16.mxu0 %v4147_v4  ;;  %v390_v1 = vld [vmem:[#allocation5 + $0xa70] sm:$0xff]  ;;  %v4226_v4 = vcombine.low %v394_v55, %v398_v56  ;;  %v219_v56 = vld [vmem:[#allocation5 + $0x518] sm:$0xff] }
 0x185   :  { %3662 = vmatpush1.bf16.msra.mxu1 %v4282_v3  ;;  %v514_v2 = vld [vmem:[#allocation5 + $0xe50] sm:$0xff]  ;;  %v4219_v5 = vcombine.high %v386_v17, %v390_v1 }
 0x186   :  { %3663 = vmatprep.subr.bf16.mxu1 %v4275_v25  ;;  %v518_v3 = vld [vmem:[#allocation5 + $0xe70] sm:$0xff]  ;;  %v4354_v25 = vcombine.low %v522_v57, %v526_v60  ;;  %v223_v57 = vld [vmem:[#allocation5 + $0x538] sm:$0xff] }
 0x187   :  { %3623 = vmatpush1.bf16.msra.mxu0 %v4146_v8  ;;  %v4347_v6 = vcombine.high %v514_v2, %v518_v3  ;;  %v378_v7 = vld [vmem:[#allocation5 + $0xa10] sm:$0xff] }
 0x188   :  { %3624 = vmatprep.subr.bf16.mxu0 %v4267_v11  ;;  %v382_v23 = vld [vmem:[#allocation5 + $0xa30] sm:$0xff]  ;;  %v4218_v11 = vcombine.low %v386_v17, %v390_v1  ;;  %v4053_v1 = vcombine.high %v219_v56, %v223_v57 }
 0x189   :  { %3664 = vmatpush1.bf16.msra.mxu1 %v4274_v9  ;;  %v506_v8 = vld [vmem:[#allocation5 + $0xe10] sm:$0xff]  ;;  %v4211_v13 = vcombine.high %v378_v7, %v382_v23 }
 0x18a   :  { %3665 = vmatprep.subr.bf16.mxu1 %v4395_v12  ;;  %v510_v9 = vld [vmem:[#allocation5 + $0xe30] sm:$0xff]  ;;  %v4346_v12 = vcombine.low %v514_v2, %v518_v3  ;;  %v83_v2 = vld [vmem:[#allocation5 + $0xd8] sm:$0xff] }
 0x18b   :  { %3625 = vmatpush2.bf16.msra.mxu0 %v4266_v18  ;;  %v4339_v14 = vcombine.high %v506_v8, %v510_v9  ;;  %v243_v18 = vld [vmem:[#allocation5 + $0x5d8] sm:$0xff] }
 0x18c   :  { %3626 = vmatprep.subr.bf16.mxu0 %v4259_v24  ;;  %v4210_v24 = vcombine.low %v378_v7, %v382_v23  ;;  %v87_v3 = vld [vmem:[#allocation5 + $0xf8] sm:$0xff] }
 0x18d   :  { %3666 = vmatpush2.bf16.msra.mxu1 %v4394_v21  ;;  %v247_v21 = vld [vmem:[#allocation5 + $0x5f8] sm:$0xff] }
 0x18e   :  { %3667 = vmatprep.subr.bf16.mxu1 %v4387_v53  ;;  %v4338_v53 = vcombine.low %v506_v8, %v510_v9  ;;  %v4077_v54 = vcombine.high %v243_v18, %v247_v21  ;;  %v75_v7 = vld [vmem:[#allocation5 + $0x98] sm:$0xff] }
 0x18f   :  { %3627 = vmatpush2.bf16.msra.mxu0 %v4258_v33  ;;  %v235_v33 = vld [vmem:[#allocation5 + $0x598] sm:$0xff] }
 0x190   :  { %3628 = vmatprep.subr.bf16.mxu0 %v4251_v35  ;;  %v3948_v35 = vcombine.low %v115_v15, %v119_v28  ;;  %v79_v23 = vld [vmem:[#allocation5 + $0xb8] sm:$0xff] }
 0x191   :  { %3668 = vmatpush2.bf16.msra.mxu1 %v4386_v34  ;;  %v239_v34 = vld [vmem:[#allocation5 + $0x5b8] sm:$0xff] }
 0x192   :  { %3669 = vmatprep.subr.bf16.mxu1 %v4379_v37  ;;  %v4076_v37 = vcombine.low %v243_v18, %v247_v21  ;;  %v4069_v40 = vcombine.high %v235_v33, %v239_v34  ;;  %v4068_v22 = vcombine.low %v235_v33, %v239_v34  ;;  %v203_v8 = vld [vmem:[#allocation5 + $0x498] sm:$0xff] }
 0x193   :  { %3629 = vmatpush2.bf16.msra.mxu0 %v4250_v43  ;;  %v207_v9 = vld [vmem:[#allocation5 + $0x4b8] sm:$0xff] }
 0x194   :  { %3630 = vmatprep.subr.bf16.mxu0 %v4243_v45  ;;  %v231_v45 = vld [vmem:[#allocation5 + $0x578] sm:$0xff] }
 0x195   :  { %3670 = vmatpush2.bf16.msra.mxu1 %v4378_v44  ;;  %v227_v44 = vld [vmem:[#allocation5 + $0x558] sm:$0xff] }
 0x196   :  { %3671 = vmatprep.subr.bf16.mxu1 %v4371_v19  ;;  %v67_v15 = vld [vmem:[#allocation5 + $0x58] sm:$0xff] }
 0x197   :  { %3631 = vmatpush2.bf16.msra.mxu0 %v4242_v49  ;;  %v71_v28 = vld [vmem:[#allocation5 + $0x78] sm:$0xff] }
 0x198   :  { %3632 = vmatprep.subr.bf16.mxu0 %v4235_v51  ;;  %v91_v51 = vld [vmem:[#allocation5 + $0x118] sm:$0xff] }
 0x199   :  { %3672 = vmatpush2.bf16.msra.mxu1 %v4370_v50  ;;  %v4061_v50 = vcombine.high %v227_v44, %v231_v45  ;;  %v195_v18 = vld [vmem:[#allocation5 + $0x458] sm:$0xff] }
 0x19a   :  { %3673 = vmatprep.subr.bf16.mxu1 %v4363_v52  ;;  %v95_v52 = vld [vmem:[#allocation5 + $0x138] sm:$0xff] }
 0x19b   :  { %3633 = vmatpush2.bf16.msra.mxu0 %v4234_v61  ;;  %v3932_v61 = vcombine.low %v99_v41, %v103_v42  ;;  %v199_v21 = vld [vmem:[#allocation5 + $0x478] sm:$0xff] }
 0x19c   :  { %3634 = vmatprep.subr.bf16.mxu0 %v4227_v63  ;;  %v4060_v63 = vcombine.low %v227_v44, %v231_v45  ;;  %v187_v33 = vld [vmem:[#allocation5 + $0x418] sm:$0xff] }
 0x19d   :  { %3674 = vmatpush2.bf16.msra.mxu1 %v4362_v62  ;;  %v191_v34 = vld [vmem:[#allocation5 + $0x438] sm:$0xff] }
 0x19e   :  { %3675 = vmatprep.subr.bf16.mxu1 %v4355_v0  ;;  %v3925_v0 = vcombine.high %v91_v51, %v95_v52  ;;  %v179_v41 = vld [vmem:[#allocation5 + $0x3d8] sm:$0xff] }
 0x19f   :  { %3635 = vmatpush2.bf16.msra.mxu0 %v4226_v4  ;;  %v211_v4 = vld [vmem:[#allocation5 + $0x4d8] sm:$0xff] }
 0x1a0   :  { %3636 = vmatprep.subr.bf16.mxu0 %v4219_v5  ;;  %v3917_v5 = vcombine.high %v83_v2, %v87_v3  ;;  %v183_v42 = vld [vmem:[#allocation5 + $0x3f8] sm:$0xff] }
 0x1a1   :  { %3676 = vmatpush2.bf16.msra.mxu1 %v4354_v25  ;;  %v3924_v25 = vcombine.low %v91_v51, %v95_v52  ;;  %v307_v44 = vld [vmem:[#allocation5 + $0x7d8] sm:$0xff] }
 0x1a2   :  { %3677 = vmatprep.subr.bf16.mxu1 %v4347_v6  ;;  %v311_v45 = vld [vmem:[#allocation5 + $0x7f8] sm:$0xff] }
 0x1a3   :  { %3637 = vmatpush2.bf16.msra.mxu0 %v4218_v11  ;;  %v3916_v11 = vcombine.low %v83_v2, %v87_v3  ;;  %v171_v51 = vld [vmem:[#allocation5 + $0x398] sm:$0xff] }
 0x1a4   :  { %3638 = vmatprep.subr.bf16.mxu0 %v4211_v13  ;;  %v3909_v13 = vcombine.high %v75_v7, %v79_v23  ;;  %v175_v52 = vld [vmem:[#allocation5 + $0x3b8] sm:$0xff] }
 0x1a5   :  { %3678 = vmatpush2.bf16.msra.mxu1 %v4346_v12  ;;  %v4004_v2 = vcombine.low %v171_v51, %v175_v52 }
 0x1a6   :  { %3679 = vmatprep.subr.bf16.mxu1 %v4339_v14  ;;  %v4037_v14 = vcombine.high %v203_v8, %v207_v9 }
 0x1a7   :  { %3639 = vmatpush2.bf16.msra.mxu0 %v4210_v24  ;;  %v3908_v24 = vcombine.low %v75_v7, %v79_v23 }
 0x1a8   :  { %3690 = vmatprep.subr.bf16.mxu0 %v3949_v26  ;;  %v3901_v26 = vcombine.high %v67_v15, %v71_v28 }
 0x1a9   :  { %3680 = vmatpush2.bf16.msra.mxu1 %v4338_v53  ;;  %v4036_v53 = vcombine.low %v203_v8, %v207_v9 }
 0x1aa   :  { %3731 = vmatprep.subr.bf16.mxu1 %v4077_v54  ;;  %v4616_v43 = vpop.f32.mrf.mxu0  ;;  %3641 = vmatmul.mubr.bf16.vlgmr.msra.gmra.mxu0 %v4574_v36  ;;  %v4029_v54 = vcombine.high %v195_v18, %v199_v21 }
 0x1ab   :  { %3691 = vmatpush1.bf16.msra.mxu0 %v3948_v35  ;;  %3722 = vmatprep.mubr.bf16.mxu0 %v4540_v58  ;;  %v215_v58 = vld [vmem:[#allocation5 + $0x4f8] sm:$0xff]  ;;  %v3900_v35 = vcombine.low %v67_v15, %v71_v28 }
 0x1ac   :  { %v4619_v19 = vpop.f32.mrf.mxu1  ;;  %3682 = vmatmul.mubr.bf16.vlgmr.msra.gmra.mxu1 %v4578_v39  ;;  %v4622_v47 = vpop.f32.mrf.mxu0  ;;  %3692 = vmatprep.subr.bf16.mxu0 %v3941_v38  ;;  %v4045_v6 = vcombine.high %v211_v4, %v215_v58  ;;  %v4044_v12 = vcombine.low %v211_v4, %v215_v58  ;;  %v3893_v38 = vcombine.high %v59_v30, %v63_v32 }
 0x1ad   :  { %3732 = vmatpush1.bf16.msra.mxu1 %v4076_v37  ;;  %3763 = vmatprep.mubr.bf16.mxu1 %v4544_v59  ;;  %v4052_v59 = vcombine.low %v219_v56, %v223_v57  ;;  %v4028_v37 = vcombine.low %v195_v18, %v199_v21  ;;  %v303_v56 = vld [vmem:[#allocation5 + $0x7b8] sm:$0xff]  ;;  %v4012_v57 = vcombine.low %v179_v41, %v183_v42 }
 0x1ae   :  { %v4624_v49 = vpop.f32.mrf.mxu1  ;;  %3733 = vmatprep.subr.bf16.mxu1 %v4069_v40  ;;  %v3400_v55 = vpop.f32.mrf.mxu0  ;;  %v4021_v40 = vcombine.high %v187_v33, %v191_v34 }
 0x1af   :  { %3693 = vmatpush1.bf16.msra.mxu0 %v3940_v46  ;;  %v3892_v46 = vcombine.low %v59_v30, %v63_v32  ;;  %v299_v55 = vld [vmem:[#allocation5 + $0x798] sm:$0xff] }
 0x1b0   :  { %v3441_v60 = vpop.f32.mrf.mxu1  ;;  %v3401_v62 = vpop.f32.mrf.mxu0  ;;  %3694 = vmatprep.subr.bf16.mxu0 %v3933_v48  ;;  %v4013_v48 = vcombine.high %v179_v41, %v183_v42  ;;  %v4132_v3 = vcombine.low %v299_v55, %v303_v56 }
 0x1b1   :  { %3734 = vmatpush1.bf16.msra.mxu1 %v4068_v22  ;;  %v4020_v22 = vcombine.low %v187_v33, %v191_v34  ;;  %v4140_v60 = vcombine.low %v307_v44, %v311_v45  ;;  %v4133_v62 = vcombine.high %v299_v55, %v303_v56 }
 0x1b2   :  { %v3442_v17 = vpop.f32.mrf.mxu1  ;;  %3735 = vmatprep.subr.bf16.mxu1 %v4061_v50  ;;  %v4141_v50 = vcombine.high %v307_v44, %v311_v45  ;;  %v580_v45 = vsub.s32 2, %v4600_v10 }
 0x1b3   :  { %3695 = vmatpush1.bf16.msra.mxu0 %v3932_v61  ;;  %v4005_v61 = vcombine.high %v171_v51, %v175_v52  ;;  %v291_v17 = vld [vmem:[#allocation5 + $0x758] sm:$0xff]  ;;  %v584_v52 = vsub.s32 3, %v4600_v10 }
 0x1b4   :  { %3696 = vmatprep.subr.bf16.mxu0 %v3925_v0  ;;  %v167_v0 = vld [vmem:[#allocation5 + $0x378] sm:$0xff] }
 0x1b5   :  { %3736 = vmatpush1.bf16.msra.mxu1 %v4060_v63  ;;  %v163_v63 = vld [vmem:[#allocation5 + $0x358] sm:$0xff] }
 0x1b6   :  { %3737 = vmatprep.subr.bf16.mxu1 %v4053_v1  ;;  %v295_v1 = vld [vmem:[#allocation5 + $0x778] sm:$0xff]  ;;  %v3997_v4 = vcombine.high %v163_v63, %v167_v0  ;;  %v3996_v7 = vcombine.low %v163_v63, %v167_v0 }
 0x1b7   :  { %3697 = vmatpush1.bf16.msra.mxu0 %v3924_v25  ;;  %v4125_v58 = vcombine.high %v291_v17, %v295_v1  ;;  %v155_v25 = vld [vmem:[#allocation5 + $0x318] sm:$0xff]  ;;  %v4124_v23 = vcombine.low %v291_v17, %v295_v1  ;;  %v585_v1 = vrot.slane %v4603_v31, %v584_v52 }
 0x1b8   :  { %3698 = vmatprep.subr.bf16.mxu0 %v3917_v5  ;;  %v283_v5 = vld [vmem:[#allocation5 + $0x718] sm:$0xff] }
 0x1b9   :  { %3738 = vmatpush1.bf16.msra.mxu1 %v4052_v59  ;;  %v159_v59 = vld [vmem:[#allocation5 + $0x338] sm:$0xff] }
 0x1ba   :  { %3739 = vmatprep.subr.bf16.mxu1 %v4045_v6  ;;  %v287_v6 = vld [vmem:[#allocation5 + $0x738] sm:$0xff]  ;;  %v3989_v8 = vcombine.high %v155_v25, %v159_v59  ;;  %v3988_v15 = vcombine.low %v155_v25, %v159_v59 }
 0x1bb   :  { %3699 = vmatpush1.bf16.msra.mxu0 %v3916_v11  ;;  %v4117_v9 = vcombine.high %v283_v5, %v287_v6  ;;  %v147_v11 = vld [vmem:[#allocation5 + $0x2d8] sm:$0xff]  ;;  %v4116_v28 = vcombine.low %v283_v5, %v287_v6 }
 0x1bc   :  { %3700 = vmatprep.subr.bf16.mxu0 %v3909_v13  ;;  %v275_v13 = vld [vmem:[#allocation5 + $0x6d8] sm:$0xff] }
 0x1bd   :  { %3740 = vmatpush1.bf16.msra.mxu1 %v4044_v12  ;;  %v151_v12 = vld [vmem:[#allocation5 + $0x2f8] sm:$0xff] }
 0x1be   :  { %3741 = vmatprep.subr.bf16.mxu1 %v4037_v14  ;;  %v279_v14 = vld [vmem:[#allocation5 + $0x6f8] sm:$0xff]  ;;  %v3981_v18 = vcombine.high %v147_v11, %v151_v12  ;;  %v3980_v30 = vcombine.low %v147_v11, %v151_v12 }
 0x1bf   :  { %3701 = vmatpush1.bf16.msra.mxu0 %v3908_v24  ;;  %v4109_v21 = vcombine.high %v275_v13, %v279_v14  ;;  %v139_v24 = vld [vmem:[#allocation5 + $0x298] sm:$0xff]  ;;  %v4108_v32 = vcombine.low %v275_v13, %v279_v14 }
 0x1c0   :  { %3702 = vmatprep.subr.bf16.mxu0 %v3901_v26  ;;  %v267_v26 = vld [vmem:[#allocation5 + $0x698] sm:$0xff] }
 0x1c1   :  { %3742 = vmatpush1.bf16.msra.mxu1 %v4036_v53  ;;  %v143_v53 = vld [vmem:[#allocation5 + $0x2b8] sm:$0xff] }
 0x1c2   :  { %3743 = vmatprep.subr.bf16.mxu1 %v4029_v54  ;;  %v271_v54 = vld [vmem:[#allocation5 + $0x6b8] sm:$0xff]  ;;  %v3973_v33 = vcombine.high %v139_v24, %v143_v53  ;;  %v3972_v41 = vcombine.low %v139_v24, %v143_v53 }
 0x1c3   :  { %3703 = vmatpush1.bf16.msra.mxu0 %v3900_v35  ;;  %v4101_v34 = vcombine.high %v267_v26, %v271_v54  ;;  %v131_v35 = vld [vmem:[#allocation5 + $0x258] sm:$0xff]  ;;  %v4100_v42 = vcombine.low %v267_v26, %v271_v54 }
 0x1c4   :  { %3704 = vmatprep.subr.bf16.mxu0 %v3893_v38  ;;  %v259_v38 = vld [vmem:[#allocation5 + $0x658] sm:$0xff] }
 0x1c5   :  { %3744 = vmatpush1.bf16.msra.mxu1 %v4028_v37  ;;  %v135_v37 = vld [vmem:[#allocation5 + $0x278] sm:$0xff] }
 0x1c6   :  { %3745 = vmatprep.subr.bf16.mxu1 %v4021_v40  ;;  %v263_v40 = vld [vmem:[#allocation5 + $0x678] sm:$0xff]  ;;  %v3965_v44 = vcombine.high %v131_v35, %v135_v37  ;;  %v3964_v55 = vcombine.low %v131_v35, %v135_v37 }
 0x1c7   :  { %3705 = vmatpush1.bf16.msra.mxu0 %v3892_v46  ;;  %v4093_v46 = vcombine.high %v259_v38, %v263_v40  ;;  %v255_v51 = vld [vmem:[#allocation5 + $0x638] sm:$0xff]  ;;  %v4092_v56 = vcombine.low %v259_v38, %v263_v40 }
 0x1c8   :  { %3706 = vmatprep.subr.bf16.mxu0 %v4013_v48  ;;  %v127_v48 = vld [vmem:[#allocation5 + $0x238] sm:$0xff] }
 0x1c9   :  { %3746 = vmatpush1.bf16.msra.mxu1 %v4020_v22  ;;  %v123_v22 = vld [vmem:[#allocation5 + $0x218] sm:$0xff] }
 0x1ca   :  { %3747 = vmatprep.subr.bf16.mxu1 %v4141_v50  ;;  %v251_v50 = vld [vmem:[#allocation5 + $0x618] sm:$0xff] }
 0x1cb   :  { %3707 = vmatpush2.bf16.msra.mxu0 %v4012_v57  ;;  %v3957_v57 = vcombine.high %v123_v22, %v127_v48  ;;  %v375_v63 = vld [vmem:[#allocation5 + $0x9f8] sm:$0xff] }
 0x1cc   :  { %3708 = vmatprep.subr.bf16.mxu0 %v4005_v61  ;;  %v4085_v61 = vcombine.high %v251_v50, %v255_v51  ;;  %v499_v0 = vld [vmem:[#allocation5 + $0xdd8] sm:$0xff] }
 0x1cd   :  { %3748 = vmatpush2.bf16.msra.mxu1 %v4140_v60  ;;  %v581_v60 = vrot.slane %v4603_v31, %v580_v45  ;;  %v503_v17 = vld [vmem:[#allocation5 + $0xdf8] sm:$0xff] }
 0x1ce   :  { %3749 = vmatprep.subr.bf16.mxu1 %v4133_v62  ;;  %v371_v62 = vld [vmem:[#allocation5 + $0x9d8] sm:$0xff]  ;;  %v4333_v25 = vcombine.high %v499_v0, %v503_v17  ;;  %v4332_v31 = vcombine.low %v499_v0, %v503_v17 }
 0x1cf   :  { %3709 = vmatpush2.bf16.msra.mxu0 %v4004_v2  ;;  %v3956_v2 = vcombine.low %v123_v22, %v127_v48  ;;  %v363_v59 = vld [vmem:[#allocation5 + $0x998] sm:$0xff] }
 0x1d0   :  { %3710 = vmatprep.subr.bf16.mxu0 %v3997_v4  ;;  %v4205_v4 = vcombine.high %v371_v62, %v375_v63  ;;  %v367_v5 = vld [vmem:[#allocation5 + $0x9b8] sm:$0xff] }
 0x1d1   :  { %3750 = vmatpush2.bf16.msra.mxu1 %v4132_v3  ;;  %v4084_v3 = vcombine.low %v251_v50, %v255_v51  ;;  %v491_v6 = vld [vmem:[#allocation5 + $0xd98] sm:$0xff]  ;;  %v4196_v24 = vcombine.low %v363_v59, %v367_v5 }
 0x1d2   :  { %3751 = vmatprep.subr.bf16.mxu1 %v4125_v58  ;;  %v3397_v58 = vadd.f32 %v4616_v43, %v581_v60  ;;  %v355_v13 = vld [vmem:[#allocation5 + $0x958] sm:$0xff] }
 0x1d3   :  { %3711 = vmatpush2.bf16.msra.mxu0 %v3996_v7  ;;  %v495_v7 = vld [vmem:[#allocation5 + $0xdb8] sm:$0xff] }
 0x1d4   :  { %3712 = vmatprep.subr.bf16.mxu0 %v3989_v8  ;;  %v4204_v8 = vcombine.low %v371_v62, %v375_v63  ;;  %v3438_v11 = vadd.f32 %v4619_v19, %v3397_v58  ;;  %v4325_v12 = vcombine.high %v491_v6, %v495_v7  ;;  %v359_v43 = vld [vmem:[#allocation5 + $0x978] sm:$0xff]  ;;  %v4324_v19 = vcombine.low %v491_v6, %v495_v7 }
 0x1d5   :  { %3752 = vmatpush2.bf16.msra.mxu1 %v4124_v23  ;;  %v3399_v23 = vadd.f32 %v4622_v47, %v585_v1  ;;  %v4189_v26 = vcombine.high %v355_v13, %v359_v43  ;;  %v475_v35 = vld [vmem:[#allocation5 + $0xd18] sm:$0xff]  ;;  %v4188_v40 = vcombine.low %v355_v13, %v359_v43 }
 0x1d6   :  { %3753 = vmatprep.subr.bf16.mxu1 %v4117_v9  ;;  %v4197_v9 = vcombine.high %v363_v59, %v367_v5  ;;  %v479_v37 = vld [vmem:[#allocation5 + $0xd38] sm:$0xff] }
 0x1d7   :  { %3713 = vmatpush2.bf16.msra.mxu0 %v3988_v15  ;;  %v483_v15 = vld [vmem:[#allocation5 + $0xd58] sm:$0xff]  ;;  %v4308_v51 = vcombine.low %v475_v35, %v479_v37 }
 0x1d8   :  { %3714 = vmatprep.subr.bf16.mxu0 %v3981_v18  ;;  %v3440_v18 = vadd.f32 %v4624_v49, %v3399_v23  ;;  %v343_v22 = vld [vmem:[#allocation5 + $0x8f8] sm:$0xff] }
 0x1d9   :  { %3754 = vmatpush2.bf16.msra.mxu1 %v4116_v28  ;;  %v487_v28 = vld [vmem:[#allocation5 + $0xd78] sm:$0xff] }
 0x1da   :  { %3755 = vmatprep.subr.bf16.mxu1 %v4109_v21  ;;  %v467_v48 = vld [vmem:[#allocation5 + $0xcd8] sm:$0xff] }
 0x1db   :  { %3715 = vmatpush2.bf16.msra.mxu0 %v3980_v30  ;;  %v471_v50 = vld [vmem:[#allocation5 + $0xcf8] sm:$0xff] }
 0x1dc   :  { %3716 = vmatprep.subr.bf16.mxu0 %v3973_v33  ;;  %v347_v33 = vld [vmem:[#allocation5 + $0x918] sm:$0xff]  ;;  %v4300_v63 = vcombine.low %v467_v48, %v471_v50 }
 0x1dd   :  { %3756 = vmatpush2.bf16.msra.mxu1 %v4108_v32  ;;  %v459_v60 = vld [vmem:[#allocation5 + $0xc98] sm:$0xff] }
 0x1de   :  { %3757 = vmatprep.subr.bf16.mxu1 %v4101_v34  ;;  %v351_v34 = vld [vmem:[#allocation5 + $0x938] sm:$0xff] }
 0x1df   :  { %3717 = vmatpush2.bf16.msra.mxu0 %v3972_v41  ;;  %v323_v1 = vld [vmem:[#allocation5 + $0x858] sm:$0xff] }
 0x1e0   :  { %3718 = vmatprep.subr.bf16.mxu0 %v3965_v44  ;;  %v4181_v44 = vcombine.high %v347_v33, %v351_v34  ;;  %v315_v6 = vld [vmem:[#allocation5 + $0x818] sm:$0xff] }
 0x1e1   :  { %3758 = vmatpush2.bf16.msra.mxu1 %v4100_v42  ;;  %v4316_v42 = vcombine.low %v483_v15, %v487_v28  ;;  %v319_v7 = vld [vmem:[#allocation5 + $0x838] sm:$0xff] }
 0x1e2   :  { %3759 = vmatprep.subr.bf16.mxu1 %v4093_v46  ;;  %v4309_v46 = vcombine.high %v475_v35, %v479_v37  ;;  %v443_v23 = vld [vmem:[#allocation5 + $0xc18] sm:$0xff] }
 0x1e3   :  { %3719 = vmatpush2.bf16.msra.mxu0 %v3964_v55  ;;  %v4301_v55 = vcombine.high %v467_v48, %v471_v50  ;;  %v435_v13 = vld [vmem:[#allocation5 + $0xbd8] sm:$0xff] }
 0x1e4   :  { %3720 = vmatprep.subr.bf16.mxu0 %v3957_v57  ;;  %v335_v57 = vld [vmem:[#allocation5 + $0x8b8] sm:$0xff] }
 0x1e5   :  { %3760 = vmatpush2.bf16.msra.mxu1 %v4092_v56  ;;  %v331_v56 = vld [vmem:[#allocation5 + $0x898] sm:$0xff] }
 0x1e6   :  { %3761 = vmatprep.subr.bf16.mxu1 %v4085_v61  ;;  %v463_v61 = vld [vmem:[#allocation5 + $0xcb8] sm:$0xff]  ;;  %v4165_v0 = vcombine.high %v331_v56, %v335_v57  ;;  %v4164_v58 = vcombine.low %v331_v56, %v335_v57 }
 0x1e7   :  { %3721 = vmatpush2.bf16.msra.mxu0 %v3956_v2  ;;  %v4293_v17 = vcombine.high %v459_v60, %v463_v61  ;;  %v327_v2 = vld [vmem:[#allocation5 + $0x878] sm:$0xff] }
 0x1e8   :  { %3772 = vmatprep.subr.bf16.mxu0 %v4205_v4  ;;  %v455_v4 = vld [vmem:[#allocation5 + $0xc78] sm:$0xff]  ;;  %v4157_v59 = vcombine.high %v323_v1, %v327_v2 }
 0x1e9   :  { %3762 = vmatpush2.bf16.msra.mxu1 %v4084_v3  ;;  %v451_v3 = vld [vmem:[#allocation5 + $0xc58] sm:$0xff] }
 0x1ea   :  { %3813 = vmatprep.subr.bf16.mxu1 %v4333_v25  ;;  %v3478_v14 = vpop.f32.mrf.mxu0  ;;  %3723 = vmatmul.mubr.bf16.vlgmr.msra.gmra.mxu0 %v4550_v16  ;;  %v4317_v16 = vcombine.high %v483_v15, %v487_v28  ;;  %v4292_v25 = vcombine.low %v459_v60, %v463_v61  ;;  %v4285_v5 = vcombine.high %v451_v3, %v455_v4  ;;  %v439_v43 = vld [vmem:[#allocation5 + $0xbf8] sm:$0xff] }
 0x1eb   :  { %v3479_v47 = vadd.f32 %v3478_v14, %v3438_v11  ;;  %3773 = vmatpush1.bf16.msra.mxu0 %v4204_v8  ;;  %3804 = vmatprep.mubr.bf16.mxu0 %v4562_v27  ;;  %v339_v27 = vld [vmem:[#allocation5 + $0x8d8] sm:$0xff]  ;;  %v4149_v11 = vcombine.high %v315_v6, %v319_v7  ;;  %v4148_v28 = vcombine.low %v315_v6, %v319_v7 }
 0x1ec   :  { %v3519_v21 = vpop.f32.mrf.mxu1  ;;  %3764 = vmatmul.mubr.bf16.vlgmr.msra.gmra.mxu1 %v4556_v20  ;;  %v3480_v53 = vpop.f32.mrf.mxu0  ;;  %3774 = vmatprep.subr.bf16.mxu0 %v4197_v9  ;;  %v4173_v52 = vcombine.high %v339_v27, %v343_v22  ;;  %v4172_v62 = vcombine.low %v339_v27, %v343_v22  ;;  %v447_v8 = vld [vmem:[#allocation5 + $0xc38] sm:$0xff]  ;;  %v4284_v9 = vcombine.low %v451_v3, %v455_v4 }
 0x1ed   :  { %3814 = vmatpush1.bf16.msra.mxu1 %v4332_v31  ;;  %v3520_v54 = vadd.f32 %v3519_v21, %v3479_v47  ;;  %v3481_v30 = vadd.f32 %v3480_v53, %v3440_v18  ;;  %3845 = vmatprep.mubr.bf16.mxu1 %v4567_v29  ;;  %v4180_v29 = vcombine.low %v347_v33, %v351_v34  ;;  %v563_v14 = vld [vmem:[#allocation5 + $0xfd8] sm:$0xff] }
 0x1ee   :  { %v3521_v32 = vpop.f32.mrf.mxu1  ;;  %3815 = vmatprep.subr.bf16.mxu1 %v4325_v12  ;;  %v3482_v49 = vpop.f32.mrf.mxu0  ;;  %v4156_v31 = vcombine.low %v323_v1, %v327_v2  ;;  %v4277_v12 = vcombine.high %v443_v23, %v447_v8  ;;  %v567_v15 = vld [vmem:[#allocation5 + $0xff8] sm:$0xff]  ;;  %v4276_v18 = vcombine.low %v443_v23, %v447_v8  ;;  %v4269_v47 = vcombine.high %v435_v13, %v439_v43 }
 0x1ef   :  { %3856 = vst [vmem:[#allocation8 + $0x10] sm:$0xff] %v3520_v54  ;;  %v3522_v20 = vadd.f32 %v3521_v32, %v3481_v30  ;;  %3775 = vmatpush1.bf16.msra.mxu0 %v4196_v24  ;;  %v4397_v21 = vcombine.high %v563_v14, %v567_v15  ;;  %v427_v24 = vld [vmem:[#allocation5 + $0xb98] sm:$0xff]  ;;  %v4268_v54 = vcombine.low %v435_v13, %v439_v43 }
 0x1f0   :  { %v3523_v38 = vpop.f32.mrf.mxu1  ;;  %v3483_v41 = vpop.f32.mrf.mxu0  ;;  %3776 = vmatprep.subr.bf16.mxu0 %v4189_v26  ;;  %v431_v53 = vld [vmem:[#allocation5 + $0xbb8] sm:$0xff]  ;;  %v4396_v30 = vcombine.low %v563_v14, %v567_v15 }
 0x1f1   :  { %3816 = vmatpush1.bf16.msra.mxu1 %v4324_v19  ;;  %3857 = vst [vmem:[#allocation8 + $0x18] sm:$0xff] %v3522_v20  ;;  %v555_v19 = vld [vmem:[#allocation5 + $0xf98] sm:$0xff]  ;;  %v4261_v32 = vcombine.high %v427_v24, %v431_v53  ;;  %v4260_v37 = vcombine.low %v427_v24, %v431_v53 }
 0x1f2   :  { %v3524_v45 = vpop.f32.mrf.mxu1  ;;  %3817 = vmatprep.subr.bf16.mxu1 %v4317_v16  ;;  %v559_v26 = vld [vmem:[#allocation5 + $0xfb8] sm:$0xff] }
 0x1f3   :  { %3777 = vmatpush1.bf16.msra.mxu0 %v4188_v40  ;;  %v4389_v16 = vcombine.high %v555_v19, %v559_v26  ;;  %v419_v33 = vld [vmem:[#allocation5 + $0xb58] sm:$0xff]  ;;  %v4388_v20 = vcombine.low %v555_v19, %v559_v26 }
 0x1f4   :  { %3778 = vmatprep.subr.bf16.mxu0 %v4181_v44  ;;  %v423_v34 = vld [vmem:[#allocation5 + $0xb78] sm:$0xff] }
 0x1f5   :  { %3818 = vmatpush1.bf16.msra.mxu1 %v4316_v42  ;;  %v547_v49 = vld [vmem:[#allocation5 + $0xf58] sm:$0xff]  ;;  %v4253_v38 = vcombine.high %v419_v33, %v423_v34 }
 0x1f6   :  { %3819 = vmatprep.subr.bf16.mxu1 %v4309_v46  ;;  %v551_v35 = vld [vmem:[#allocation5 + $0xf78] sm:$0xff]  ;;  %v4252_v46 = vcombine.low %v419_v33, %v423_v34 }
 0x1f7   :  { %3779 = vmatpush1.bf16.msra.mxu0 %v4180_v29  ;;  %v4381_v40 = vcombine.high %v547_v49, %v551_v35  ;;  %v411_v41 = vld [vmem:[#allocation5 + $0xb18] sm:$0xff]  ;;  %v4380_v27 = vcombine.low %v547_v49, %v551_v35 }
 0x1f8   :  { %3780 = vmatprep.subr.bf16.mxu0 %v4173_v52  ;;  %v415_v42 = vld [vmem:[#allocation5 + $0xb38] sm:$0xff] }
 0x1f9   :  { %3820 = vmatpush1.bf16.msra.mxu1 %v4308_v51  ;;  %v539_v44 = vld [vmem:[#allocation5 + $0xf18] sm:$0xff]  ;;  %v4245_v22 = vcombine.high %v411_v41, %v415_v42 }
 0x1fa   :  { %3821 = vmatprep.subr.bf16.mxu1 %v4301_v55  ;;  %v543_v45 = vld [vmem:[#allocation5 + $0xf38] sm:$0xff]  ;;  %v4244_v55 = vcombine.low %v411_v41, %v415_v42 }
 0x1fb   :  { %3781 = vmatpush1.bf16.msra.mxu0 %v4172_v62  ;;  %v4373_v48 = vcombine.high %v539_v44, %v543_v45  ;;  %v403_v50 = vld [vmem:[#allocation5 + $0xad8] sm:$0xff]  ;;  %v4372_v56 = vcombine.low %v539_v44, %v543_v45 }
 0x1fc   :  { %3782 = vmatprep.subr.bf16.mxu0 %v4165_v0  ;;  %v407_v29 = vld [vmem:[#allocation5 + $0xaf8] sm:$0xff] }
 0x1fd   :  { %3822 = vmatpush1.bf16.msra.mxu1 %v4300_v63  ;;  %v531_v51 = vld [vmem:[#allocation5 + $0xed8] sm:$0xff]  ;;  %v4237_v57 = vcombine.high %v403_v50, %v407_v29 }
 0x1fe   :  { %3823 = vmatprep.subr.bf16.mxu1 %v4293_v17  ;;  %v535_v52 = vld [vmem:[#allocation5 + $0xef8] sm:$0xff]  ;;  %v4236_v17 = vcombine.low %v403_v50, %v407_v29 }
 0x1ff   :  { %3783 = vmatpush1.bf16.msra.mxu0 %v4164_v58  ;;  %v4365_v60 = vcombine.high %v531_v51, %v535_v52  ;;  %v395_v61 = vld [vmem:[#allocation5 + $0xa98] sm:$0xff]  ;;  %v4364_v1 = vcombine.low %v531_v51, %v535_v52 }
 0x200   :  { %3784 = vmatprep.subr.bf16.mxu0 %v4157_v59  ;;  %v399_v62 = vld [vmem:[#allocation5 + $0xab8] sm:$0xff] }
 0x201   :  { %3824 = vmatpush1.bf16.msra.mxu1 %v4292_v25  ;;  %v523_v63 = vld [vmem:[#allocation5 + $0xe98] sm:$0xff]  ;;  %v4229_v2 = vcombine.high %v395_v61, %v399_v62 }
 0x202   :  { %3825 = vmatprep.subr.bf16.mxu1 %v4285_v5  ;;  %v527_v0 = vld [vmem:[#allocation5 + $0xeb8] sm:$0xff]  ;;  %v4228_v5 = vcombine.low %v395_v61, %v399_v62  ;;  %v596_v61 = vsub.s32 6, %v4600_v10  ;;  %v600_v62 = vsub.s32 7, %v4600_v10 }
 0x203   :  { %3785 = vmatpush1.bf16.msra.mxu0 %v4156_v31  ;;  %v4357_v3 = vcombine.high %v523_v63, %v527_v0  ;;  %v387_v4 = vld [vmem:[#allocation5 + $0xa58] sm:$0xff]  ;;  %v4356_v6 = vcombine.low %v523_v63, %v527_v0 }
 0x204   :  { %3786 = vmatprep.subr.bf16.mxu0 %v4149_v11  ;;  %v391_v58 = vld [vmem:[#allocation5 + $0xa78] sm:$0xff] }
 0x205   :  { %3826 = vmatpush1.bf16.msra.mxu1 %v4284_v9  ;;  %v515_v25 = vld [vmem:[#allocation5 + $0xe58] sm:$0xff]  ;;  %v4221_v7 = vcombine.high %v387_v4, %v391_v58 }
 0x206   :  { %3827 = vmatprep.subr.bf16.mxu1 %v4277_v12  ;;  %v519_v59 = vld [vmem:[#allocation5 + $0xe78] sm:$0xff]  ;;  %v4220_v12 = vcombine.low %v387_v4, %v391_v58 }
 0x207   :  { %3787 = vmatpush1.bf16.msra.mxu0 %v4148_v28  ;;  %v4349_v23 = vcombine.high %v515_v25, %v519_v59  ;;  %v379_v8 = vld [vmem:[#allocation5 + $0xa18] sm:$0xff]  ;;  %v4348_v13 = vcombine.low %v515_v25, %v519_v59 }
 0x208   :  { %3788 = vmatprep.subr.bf16.mxu0 %v4269_v47  ;;  %v383_v31 = vld [vmem:[#allocation5 + $0xa38] sm:$0xff] }
 0x209   :  { %3828 = vmatpush1.bf16.msra.mxu1 %v4276_v18  ;;  %v507_v9 = vld [vmem:[#allocation5 + $0xe18] sm:$0xff]  ;;  %v4213_v43 = vcombine.high %v379_v8, %v383_v31  ;;  %v4212_v15 = vcombine.low %v379_v8, %v383_v31 }
 0x20a   :  { %3829 = vmatprep.subr.bf16.mxu1 %v4397_v21  ;;  %v511_v11 = vld [vmem:[#allocation5 + $0xe38] sm:$0xff] }
 0x20b   :  { %3789 = vmatpush2.bf16.msra.mxu0 %v4268_v54  ;;  %v4341_v14 = vcombine.high %v507_v9, %v511_v11  ;;  %v4340_v28 = vcombine.low %v507_v9, %v511_v11 }
 0x20c   :  { %3790 = vmatprep.subr.bf16.mxu0 %v4261_v32  ;;  %v592_v32 = vsub.s32 5, %v4600_v10 }
 0x20d   :  { %3830 = vmatpush2.bf16.msra.mxu1 %v4396_v30  ;;  %v588_v30 = vsub.s32 4, %v4600_v10 }
 0x20e   :  { %3831 = vmatprep.subr.bf16.mxu1 %v4389_v16  ;;  %v4412_v16 = vld [vmem:[#allocation7] sm:$0xff] }
 0x20f   :  { %3791 = vmatpush2.bf16.msra.mxu0 %v4260_v37  ;;  %v589_v33 = vrot.slane %v4412_v16, %v588_v30  ;;  %v593_v34 = vrot.slane %v4412_v16, %v592_v32  ;;  %v597_v63 = vrot.slane %v4412_v16, %v596_v61  ;;  %v601_v0 = vrot.slane %v4412_v16, %v600_v62 }
 0x210   :  { %3792 = vmatprep.subr.bf16.mxu0 %v4253_v38 }
 0x211   :  { %3832 = vmatpush2.bf16.msra.mxu1 %v4388_v20 }
 0x212   :  { %3833 = vmatprep.subr.bf16.mxu1 %v4381_v40 }
 0x213   :  { %3793 = vmatpush2.bf16.msra.mxu0 %v4252_v46 }
 0x214   :  { %3794 = vmatprep.subr.bf16.mxu0 %v4245_v22 }
 0x215   :  { %3834 = vmatpush2.bf16.msra.mxu1 %v4380_v27 }
 0x216   :  { %3835 = vmatprep.subr.bf16.mxu1 %v4373_v48 }
 0x217   :  { %3795 = vmatpush2.bf16.msra.mxu0 %v4244_v55 }
 0x218   :  { %3796 = vmatprep.subr.bf16.mxu0 %v4237_v57 }
 0x219   :  { %3836 = vmatpush2.bf16.msra.mxu1 %v4372_v56 }
 0x21a   :  { %3837 = vmatprep.subr.bf16.mxu1 %v4365_v60 }
 0x21b   :  { %3797 = vmatpush2.bf16.msra.mxu0 %v4236_v17 }
 0x21c   :  { %3798 = vmatprep.subr.bf16.mxu0 %v4229_v2 }
 0x21d   :  { %3838 = vmatpush2.bf16.msra.mxu1 %v4364_v1 }
 0x21e   :  { %3839 = vmatprep.subr.bf16.mxu1 %v4357_v3 }
 0x21f   :  { %3799 = vmatpush2.bf16.msra.mxu0 %v4228_v5 }
 0x220   :  { %3800 = vmatprep.subr.bf16.mxu0 %v4221_v7 }
 0x221   :  { %3840 = vmatpush2.bf16.msra.mxu1 %v4356_v6 }
 0x222   :  { %3841 = vmatprep.subr.bf16.mxu1 %v4349_v23 }
 0x223   :  { %3801 = vmatpush2.bf16.msra.mxu0 %v4220_v12 }
 0x224   :  { %3802 = vmatprep.subr.bf16.mxu0 %v4213_v43 }
 0x225   :  { %3842 = vmatpush2.bf16.msra.mxu1 %v4348_v13 }
 0x226   :  { %3843 = vmatprep.subr.bf16.mxu1 %v4341_v14 }
 0x227   :  { %3803 = vmatpush2.bf16.msra.mxu0 %v4212_v15 }
 0x229   :  { %3844 = vmatpush2.bf16.msra.mxu1 %v4340_v28 }
 0x22a   :  { %v3560_v18 = vpop.f32.mrf.mxu0  ;;  %3805 = vmatmul.mubr.bf16.vlgmr.msra.gmra.mxu0 %v4574_v36 }
 0x22b   :  { %v3561_v49 = vadd.f32 %v3560_v18, %v589_v33 }
 0x22c   :  { %v3601_v47 = vpop.f32.mrf.mxu1  ;;  %3846 = vmatmul.mubr.bf16.vlgmr.msra.gmra.mxu1 %v4578_v39  ;;  %v3562_v21 = vpop.f32.mrf.mxu0 }
 0x22d   :  { %v3563_v35 = vadd.f32 %v3562_v21, %v593_v34  ;;  %v3602_v37 = vadd.f32 %v3601_v47, %v3561_v49 }
 0x22e   :  { %v3603_v24 = vpop.f32.mrf.mxu1  ;;  %v3564_v53 = vpop.f32.mrf.mxu0 }
 0x22f   :  { %v3604_v20 = vadd.f32 %v3603_v24, %v3563_v35 }
 0x230   :  { %v3605_v19 = vpop.f32.mrf.mxu1  ;;  %v3565_v26 = vpop.f32.mrf.mxu0 }
 0x232   :  { %v3606_v54 = vpop.f32.mrf.mxu1 }
 0x26a   :  { %v3642_v36 = vpop.f32.mrf.mxu0 }
 0x26b   :  { %v3643_v38 = vadd.f32 %v3642_v36, %v3602_v37 }
 0x26c   :  { %v3683_v39 = vpop.f32.mrf.mxu1  ;;  %v3644_v40 = vpop.f32.mrf.mxu0 }
 0x26d   :  { %v3684_v41 = vadd.f32 %v3683_v39, %v3643_v38  ;;  %v3645_v42 = vadd.f32 %v3644_v40, %v3604_v20 }
 0x26e   :  { %v3685_v44 = vpop.f32.mrf.mxu1  ;;  %v3646_v45 = vpop.f32.mrf.mxu0 }
 0x26f   :  { %3858 = vst [vmem:[#allocation8 + $0x20] sm:$0xff] %v3684_v41  ;;  %v3686_v46 = vadd.f32 %v3685_v44, %v3645_v42 }
 0x270   :  { %v3687_v27 = vpop.f32.mrf.mxu1  ;;  %v3647_v22 = vpop.f32.mrf.mxu0 }
 0x271   :  { %3859 = vst [vmem:[#allocation8 + $0x28] sm:$0xff] %v3686_v46 }
 0x272   :  { %v3688_v48 = vpop.f32.mrf.mxu1 }
 0x2aa   :  { %v3724_v50 = vpop.f32.mrf.mxu0 }
 0x2ab   :  { %v3725_v17 = vadd.f32 %v3724_v50, %v597_v63 }
 0x2ac   :  { %v3765_v29 = vpop.f32.mrf.mxu1  ;;  %v3726_v51 = vpop.f32.mrf.mxu0 }
 0x2ad   :  { %v3727_v1 = vadd.f32 %v3726_v51, %v601_v0  ;;  %v3766_v2 = vadd.f32 %v3765_v29, %v3725_v17 }
 0x2ae   :  { %v3767_v52 = vpop.f32.mrf.mxu1  ;;  %v3728_v55 = vpop.f32.mrf.mxu0 }
 0x2af   :  { %v3768_v4 = vadd.f32 %v3767_v52, %v3727_v1 }
 0x2b0   :  { %v3769_v56 = vpop.f32.mrf.mxu1  ;;  %v3729_v57 = vpop.f32.mrf.mxu0 }
 0x2b2   :  { %v3770_v60 = vpop.f32.mrf.mxu1 }
 0x2ea   :  { %v3806_v3 = vpop.f32.mrf.mxu0 }
 0x2eb   :  { %v3807_v58 = vadd.f32 %v3806_v3, %v3766_v2 }
 0x2ec   :  { %v3847_v25 = vpop.f32.mrf.mxu1  ;;  %v3808_v59 = vpop.f32.mrf.mxu0 }
 0x2ed   :  { %v3848_v5 = vadd.f32 %v3847_v25, %v3807_v58  ;;  %v3809_v6 = vadd.f32 %v3808_v59, %v3768_v4 }
 0x2ee   :  { %v3849_v7 = vpop.f32.mrf.mxu1  ;;  %v3810_v23 = vpop.f32.mrf.mxu0 }
 0x2ef   :  { %3860 = vst [vmem:[#allocation8 + $0x30] sm:$0xff] %v3848_v5  ;;  %v3850_v8 = vadd.f32 %v3849_v7, %v3809_v6 }
 0x2f0   :  { %v3851_v31 = vpop.f32.mrf.mxu1  ;;  %v3811_v10 = vpop.f32.mrf.mxu0 }
 0x2f1   :  { %3861 = vst [vmem:[#allocation8 + $0x38] sm:$0xff] %v3850_v8 }
 0x2f2   :  { %v3852_v9 = vpop.f32.mrf.mxu1 }
 0x2f3   :  { %4484 = shalt.err (!%p4481_p5)
}
 0x2f4   :  { %3871 = dma.vmem_to_hbm [thread:$0]  %s3869_s2, 1024, %s4652_s3, [#allocation4]  }
 0x2f5   :  { %4497 = dma.done.wait [#allocation4], 1024  }
 0x2f6   :  { %4498 = vsyncadd [#allocation4], 4294966272 }
 0x2f7   :  { %3875 = vsyncpa [#allocation3], 1 }
 0x2f8   :  { %3876 = vsyncpa [#allocation6], 1 }
 0x2f9   :  { %3877 = vsyncpa [#allocation4], 1 }

</bundles_post_ra>
